<compile_context>
chip_gen: v7x
topology: tpu7x:2x2x1
jax: 0.10.0
libtpu: 0.0.40
codegen_flags: <defaults>
</compile_context>

<pallas_src>
import functools

import jax
import jax.numpy as jnp
from jax.experimental import pallas as pl
from jax.experimental.pallas import tpu as pltpu


LANE = 128


def _round_up(v, m):
    return ((v + m - 1) // m) * m


def _pad2d(a, rows, cols):
    return jnp.pad(a, ((0, rows - a.shape[0]), (0, cols - a.shape[1])))


def _vmem_spec():
    return pl.BlockSpec(memory_space=pltpu.MemorySpace.VMEM)


def _pick_tile(dim, candidates, cap=None):
    for c in candidates:
        if cap is not None and c > cap:
            continue
        if dim >= c and dim % c == 0:
            return c
    return dim


@functools.lru_cache(maxsize=None)
def _vmem_budget_bytes():
    """Scoped-VMEM budget derived from the actual chip (48 MiB on v7x's 64 MiB VMEM,
    ~100 MiB on v5e/v6e's 128 MiB). Conservative fallback if the query fails."""
    cap = 64 * 1024 * 1024
    try:
        cap = int(pltpu.get_tpu_info().vmem_capacity_bytes)
    except Exception:
        pass
    return int(min(cap - 16 * 1024 * 1024, 100 * 1024 * 1024))


def _log_softmax(logits, valid):
    """log_softmax over axis 1 with padded class lanes masked out (f32 in/out)."""
    col = jax.lax.broadcasted_iota(jnp.int32, logits.shape, 1)
    masked = jnp.where(col < valid, logits, jnp.float32(-1e30))
    m = jnp.max(masked, axis=1, keepdims=True)
    s = masked - m
    lse = jnp.log(jnp.sum(jnp.exp(s), axis=1, keepdims=True))
    return s - lse


# ---------------------------------------------------------------------------
# Fused single-kernel encoder (small/medium graphs): adj is streamed chunk-wise
# into a persistent VMEM scratch and consumed by conv1 as chunks land; conv2 /
# spmm reuse the resident adj; bias/ReLU/log_softmax are fused epilogues.
# ---------------------------------------------------------------------------

def _fused_forward_kernel(*refs, encoder_type, n_pairs, valid_classes,
                          n_chunks, chunk):
    x_ref, adj_hbm = refs[0], refs[1]
    wb = refs[2:2 + 2 * n_pairs]
    lp_ref = refs[2 + 2 * n_pairs]
    out_ref = refs[3 + 2 * n_pairs]
    adj_vmem = refs[4 + 2 * n_pairs]
    agg1_ref = refs[5 + 2 * n_pairs]
    sems = refs[6 + 2 * n_pairs]

    # Copy-through-compute: kick off all adj chunk DMAs up-front so the first
    # GraphConvolution overlaps with their arrival.
    copies = []
    for c in range(n_chunks):
        rows = pl.ds(c * chunk, chunk)
        cp = pltpu.make_async_copy(adj_hbm.at[rows, :], adj_vmem.at[rows, :],
                                   sems.at[c])
        cp.start()
        copies.append(cp)

    x = x_ref[...]                                           # bf16
    support1 = jnp.dot(x, wb[0][...],
                       preferred_element_type=jnp.float32)   # overlaps adj DMA
    support1_bf = support1.astype(x.dtype)
    b1 = wb[1][...]

    # Consume adj row-chunks as they land:  agg1 = adj @ support1 + b1
    for c in range(n_chunks):
        copies[c].wait()
        rows = pl.ds(c * chunk, chunk)
        agg1_ref[rows, :] = (
            jnp.dot(adj_vmem[rows, :], support1_bf,
                    preferred_element_type=jnp.float32) + b1)

    # adj is now fully VMEM-resident; reuse it for the second conv / spmm.
    def graph_conv(inp_bf16, w_ref, b_ref):
        support = jnp.dot(inp_bf16, w_ref[...],
                          preferred_element_type=jnp.float32)
        agg = jnp.dot(adj_vmem[...], support.astype(jnp.bfloat16),
                      preferred_element_type=jnp.float32)
        return agg + b_ref[...]

    def dense(inp_f32, w_ref, b_ref):
        y = jnp.dot(inp_f32.astype(w_ref.dtype), w_ref[...],
                    preferred_element_type=jnp.float32)
        return y + b_ref[...]

    agg1 = agg1_ref[...]
    if encoder_type == 0:
        _, _, w2, b2, w3, b3 = wb
        h = jnp.maximum(agg1, 0.0)                               # relu(gc1)
        logits = graph_conv(h.astype(jnp.bfloat16), w2, b2)      # gc2
        out = dense(jnp.maximum(logits, 0.0), w3, b3)            # fc3(relu)
    elif encoder_type == 1:
        _, _, w2, b2, w3, b3 = wb
        h = jnp.maximum(agg1, 0.0)                               # relu(gc1)
        out = graph_conv(h.astype(jnp.bfloat16), w2, b2)         # gc3
        logits = dense(jnp.maximum(out, 0.0), w3, b3)            # fc6(relu)
    elif encoder_type == 2:
        _, _, w2, b2 = wb
        out = agg1                                               # gc1
        logits = graph_conv(jnp.maximum(agg1, 0.0).astype(jnp.bfloat16),
                            w2, b2)                              # gc2(relu)
    else:
        _, _, w3, b3 = wb
        h = jnp.maximum(agg1, 0.0)                               # relu(gc1)
        out = jnp.dot(adj_vmem[...], h.astype(jnp.bfloat16),
                      preferred_element_type=jnp.float32)        # spmm
        logits = dense(out, w3, b3)                              # fc6

    lp_ref[...] = _log_softmax(logits, valid_classes).astype(lp_ref.dtype)
    out_ref[...] = out.astype(out_ref.dtype)


def _fused_vmem_bytes(n_p, cfg, out_p):
    """VMEM requirement of the fused kernel from the actual padded shapes."""
    nfeat_p, nhid_p, nclass_p = cfg["nfeat_p"], cfg["nhid_p"], cfg["nclass_p"]
    b = 0
    b += 2 * n_p * n_p                               # bf16 adj scratch (resident)
    b += 2 * n_p * nfeat_p                           # bf16 x input
    b += 4 * n_p * nhid_p                            # f32 agg1 scratch
    b += 4 * n_p * (nclass_p + out_p)                # f32 outputs
    b += 4 * n_p * (2 * nhid_p + 2 * nclass_p + out_p)   # live f32 temporaries
    b += 2 * (nfeat_p * nhid_p + nhid_p * nhid_p + nhid_p * nclass_p
              + nclass_p * cfg["fc3_out_p"])         # weights (bf16)
    return b


def _fused_forward(pp, x, adj, encoder_type):
    cfg = pp["cfg"]
    n = x.shape[0]
    n_p = _round_up(n, LANE)

    xp = _pad2d(x, n_p, cfg["nfeat_p"]).astype(jnp.bfloat16)
    adjp = _pad2d(adj, n_p, n_p).astype(jnp.bfloat16)

    if encoder_type == 0:
        wb = [pp["gc1_w"], pp["gc1_b"], pp["gc2_w"], pp["gc2_b"],
              pp["fc3_w"], pp["fc3_b"]]
        out_p, out_v = cfg["fc3_out_p"], cfg["fc3_out"]
    elif encoder_type == 1:
        wb = [pp["gc1_w"], pp["gc1_b"], pp["gc3_w"], pp["gc3_b"],
              pp["fc6_w"], pp["fc6_b"]]
        out_p, out_v = cfg["nhid_p"], cfg["nhid"]
    elif encoder_type == 2:
        wb = [pp["gc1_w"], pp["gc1_b"], pp["gc2_w"], pp["gc2_b"]]
        out_p, out_v = cfg["nhid_p"], cfg["nhid"]
    else:
        wb = [pp["gc1_w"], pp["gc1_b"], pp["fc6_w"], pp["fc6_b"]]
        out_p, out_v = cfg["nhid_p"], cfg["nhid"]

    chunk = _pick_tile(n_p, (512, 256, 128))
    n_chunks = n_p // chunk

    kernel = functools.partial(
        _fused_forward_kernel, encoder_type=encoder_type,
        n_pairs=len(wb) // 2, valid_classes=cfg["nclass"],
        n_chunks=n_chunks, chunk=chunk)

    flops = 2 * n_p * (cfg["nfeat_p"] * cfg["nhid_p"]
                       + 2 * n_p * cfg["nhid_p"]
                       + cfg["nhid_p"] * cfg["nclass_p"]
                       + cfg["nclass_p"] * cfg["fc3_out_p"])
    in_bytes = sum(int(a.size) * a.dtype.itemsize for a in (xp, adjp, *wb))
    out_bytes = n_p * (cfg["nclass_p"] + out_p) * 4
    ce = pl.CostEstimate(flops=int(flops),
                         transcendentals=int(n_p * (cfg["nclass_p"] + 1)),
                         bytes_accessed=int(in_bytes + out_bytes))

    lp_p, o_p = pl.pallas_call(
        kernel,
        out_shape=(jax.ShapeDtypeStruct((n_p, cfg["nclass_p"]), jnp.float32),
                   jax.ShapeDtypeStruct((n_p, out_p), jnp.float32)),
        in_specs=[_vmem_spec(), pl.BlockSpec(memory_space=pl.ANY)]
                 + [_vmem_spec()] * len(wb),
        out_specs=(_vmem_spec(), _vmem_spec()),
        scratch_shapes=[pltpu.VMEM((n_p, n_p), jnp.bfloat16),
                        pltpu.VMEM((n_p, cfg["nhid_p"]), jnp.float32),
                        pltpu.SemaphoreType.DMA((n_chunks,))],
        compiler_params=pltpu.CompilerParams(
            vmem_limit_bytes=_vmem_budget_bytes()),
        cost_estimate=ce,
    )(xp, adjp, *wb)

    return lp_p[:n, :cfg["nclass"]], o_p[:n, :out_v]


# ---------------------------------------------------------------------------
# Tiled path for large graphs:
#   _matmul_tiled     : y = [relu](x) @ W + b  (small W streamed, f32 acc)
#   _adj_spmm_tiled   : y = adj @ support + b  (support VMEM-resident, adj tiled)
# log_softmax is fused into the finalize branch of the logits-producing call.
# ---------------------------------------------------------------------------

def _mm_bias_kernel(x_ref, w_ref, b_ref, *rest, apply_relu, relu_input, ls_valid):
    if ls_valid is None:
        o_ref, acc_ref = rest
        lp_ref = None
    else:
        o_ref, lp_ref, acc_ref = rest
    k = pl.program_id(1)

    @pl.when(k == 0)
    def _():
        acc_ref[...] = jnp.zeros_like(acc_ref)

    xb = x_ref[...]
    if relu_input:
        xb = jnp.maximum(xb, 0).astype(xb.dtype)
    acc_ref[...] += jnp.dot(xb, w_ref[...], preferred_element_type=jnp.float32)

    @pl.when(k == pl.num_programs(1) - 1)
    def _():
        y = acc_ref[...] + b_ref[...]
        if apply_relu:
            y = jnp.maximum(y, 0.0)
        o_ref[...] = y.astype(o_ref.dtype)
        if ls_valid is not None:
            lp_ref[...] = _log_softmax(y, ls_valid).astype(lp_ref.dtype)


def _matmul_tiled(x, w, b=None, *, apply_relu=False, relu_input=False,
                  out_dtype=jnp.float32, tm=512, tk_cap=None, ls_valid=None):
    m, k_dim = x.shape
    n_out = w.shape[1]
    if b is None:
        b = jnp.zeros((1, n_out), jnp.float32)
    tm = _pick_tile(m, (tm, 1024, 512, 256, 128, 8))
    tk = _pick_tile(k_dim, (2048, 1024, 512, 256, 128, 8), cap=tk_cap)
    grid = (m // tm, k_dim // tk)

    out_shape = [jax.ShapeDtypeStruct((m, n_out), out_dtype)]
    out_specs = [pl.BlockSpec((tm, n_out), lambda i, k: (i, 0))]
    if ls_valid is not None:
        out_shape.append(jax.ShapeDtypeStruct((m, n_out), jnp.float32))
        out_specs.append(pl.BlockSpec((tm, n_out), lambda i, k: (i, 0)))

    kernel = functools.partial(_mm_bias_kernel, apply_relu=apply_relu,
                               relu_input=relu_input, ls_valid=ls_valid)
    bytes_acc = (int(x.size) * x.dtype.itemsize + int(w.size) * w.dtype.itemsize
                 + m * n_out * jnp.dtype(out_dtype).itemsize)
    res = pl.pallas_call(
        kernel,
        out_shape=tuple(out_shape) if ls_valid is not None else out_shape[0],
        grid_spec=pltpu.PrefetchScalarGridSpec(
            num_scalar_prefetch=0,
            grid=grid,
            in_specs=[pl.BlockSpec((tm, tk), lambda i, k: (i, k)),
                      pl.BlockSpec((tk, n_out), lambda i, k: (k, 0)),
                      pl.BlockSpec((1, n_out), lambda i, k: (0, 0))],
            out_specs=tuple(out_specs) if ls_valid is not None else out_specs[0],
            scratch_shapes=[pltpu.VMEM((tm, n_out), jnp.float32)]),
        compiler_params=pltpu.CompilerParams(
            dimension_semantics=("parallel", "arbitrary"),
            vmem_limit_bytes=_vmem_budget_bytes()),
        cost_estimate=pl.CostEstimate(
            flops=int(2 * m * k_dim * n_out),
            transcendentals=int(m * n_out if ls_valid is not None else 0),
            bytes_accessed=int(bytes_acc)),
    )(x, w, b)
    return res


def _adj_spmm_kernel(adj_ref, sup_ref, b_ref, *rest, tk, apply_relu, ls_valid):
    if ls_valid is None:
        o_ref, acc_ref = rest
        lp_ref = None
    else:
        o_ref, lp_ref, acc_ref = rest
    k = pl.program_id(1)

    @pl.when(k == 0)
    def _():
        acc_ref[...] = jnp.zeros_like(acc_ref)

    # `support` is a single VMEM-resident block (constant index_map); slice the
    # k-chunk in-kernel instead of re-streaming it from HBM per row tile.
    koff = pl.multiple_of(k * tk, tk)
    acc_ref[...] += jnp.dot(adj_ref[...], sup_ref[pl.ds(koff, tk), :],
                            preferred_element_type=jnp.float32)

    @pl.when(k == pl.num_programs(1) - 1)
    def _():
        y = acc_ref[...] + b_ref[...]
        if apply_relu:
            y = jnp.maximum(y, 0.0)
        o_ref[...] = y.astype(o_ref.dtype)
        if ls_valid is not None:
            lp_ref[...] = _log_softmax(y, ls_valid).astype(lp_ref.dtype)


def _adj_spmm_tiled(adj, support, b=None, *, apply_relu=False, ls_valid=None,
                    tm=512, tk_cap=None):
    m, k_dim = adj.shape
    n_out = support.shape[1]
    if b is None:
        b = jnp.zeros((1, n_out), jnp.float32)
    tm = _pick_tile(m, (tm, 1024, 512, 256, 128, 8))
    tk = _pick_tile(k_dim, (2048, 1024, 512, 256, 128, 8), cap=tk_cap)
    grid = (m // tm, k_dim // tk)

    out_shape = [jax.ShapeDtypeStruct((m, n_out), jnp.float32)]
    out_specs = [pl.BlockSpec((tm, n_out), lambda i, k: (i, 0))]
    if ls_valid is not None:
        out_shape.append(jax.ShapeDtypeStruct((m, n_out), jnp.float32))
        out_specs.append(pl.BlockSpec((tm, n_out), lambda i, k: (i, 0)))

    kernel = functools.partial(_adj_spmm_kernel, tk=tk, apply_relu=apply_relu,
                               ls_valid=ls_valid)
    bytes_acc = (int(adj.size) * adj.dtype.itemsize
                 + int(support.size) * support.dtype.itemsize
                 + m * n_out * 4)
    res = pl.pallas_call(
        kernel,
        out_shape=tuple(out_shape) if ls_valid is not None else out_shape[0],
        grid_spec=pltpu.PrefetchScalarGridSpec(
            num_scalar_prefetch=0,
            grid=grid,
            in_specs=[pl.BlockSpec((tm, tk), lambda i, k: (i, k)),
                      # Whole `support` resident in VMEM, DMA'd once.
                      pl.BlockSpec((k_dim, n_out), lambda i, k: (0, 0)),
                      pl.BlockSpec((1, n_out), lambda i, k: (0, 0))],
            out_specs=tuple(out_specs) if ls_valid is not None else out_specs[0],
            scratch_shapes=[pltpu.VMEM((tm, n_out), jnp.float32)]),
        compiler_params=pltpu.CompilerParams(
            dimension_semantics=("parallel", "arbitrary"),
            vmem_limit_bytes=_vmem_budget_bytes()),
        cost_estimate=pl.CostEstimate(
            flops=int(2 * m * k_dim * n_out),
            transcendentals=int(m * n_out if ls_valid is not None else 0),
            bytes_accessed=int(bytes_acc)),
    )(adj, support, b)
    return res


def _tiled_forward(pp, x, adj, encoder_type, tm=512, tk_cap=None):
    cfg = pp["cfg"]
    n = x.shape[0]
    n_p = _round_up(n, max(tm, LANE))

    xp = _pad2d(x, n_p, cfg["nfeat_p"]).astype(jnp.bfloat16)
    adjp = _pad2d(adj, n_p, n_p).astype(jnp.bfloat16)

    def gc(inp_bf16, w, b, *, apply_relu=False, relu_input=False, ls_valid=None):
        support = _matmul_tiled(inp_bf16, w, None, relu_input=relu_input,
                                out_dtype=jnp.bfloat16, tm=tm, tk_cap=tk_cap)
        return _adj_spmm_tiled(adjp, support, b, apply_relu=apply_relu,
                               ls_valid=ls_valid, tm=tm, tk_cap=tk_cap)

    def lin(inp, w, b, *, relu_input=False, ls_valid=None):
        return _matmul_tiled(inp.astype(jnp.bfloat16), w, b,
                             relu_input=relu_input, out_dtype=jnp.float32,
                             tm=tm, tk_cap=tk_cap, ls_valid=ls_valid)

    if encoder_type == 0:
        h = gc(xp, pp["gc1_w"], pp["gc1_b"], apply_relu=True)
        logits, lp = gc(h.astype(jnp.bfloat16), pp["gc2_w"], pp["gc2_b"],
                        ls_valid=cfg["nclass"])
        out = lin(logits, pp["fc3_w"], pp["fc3_b"], relu_input=True)
        out_v = cfg["fc3_out"]
    elif encoder_type == 1:
        h = gc(xp, pp["gc1_w"], pp["gc1_b"], apply_relu=True)
        out = gc(h.astype(jnp.bfloat16), pp["gc3_w"], pp["gc3_b"])
        _, lp = lin(out, pp["fc6_w"], pp["fc6_b"], relu_input=True,
                    ls_valid=cfg["nclass"])
        out_v = cfg["nhid"]
    elif encoder_type == 2:
        out = gc(xp, pp["gc1_w"], pp["gc1_b"])
        _, lp = gc(out.astype(jnp.bfloat16), pp["gc2_w"], pp["gc2_b"],
                   relu_input=True, ls_valid=cfg["nclass"])
        out_v = cfg["nhid"]
    else:
        h = gc(xp, pp["gc1_w"], pp["gc1_b"], apply_relu=True)
        out = _adj_spmm_tiled(adjp, h.astype(jnp.bfloat16), None,
                              tm=tm, tk_cap=tk_cap)                  # spmm
        _, lp = lin(out, pp["fc6_w"], pp["fc6_b"], ls_valid=cfg["nclass"])
        out_v = cfg["nhid"]

    return lp[:n, :cfg["nclass"]], out[:n, :out_v]


# ---------------------------------------------------------------------------
# Parameter init (PyTorch-faithful) + one-time preparation (pad / cast / transpose)
# ---------------------------------------------------------------------------

def init_params(key, nfeat, nhid, nclass):
    ks = jax.random.split(key, 14)

    def gc_init(kw, kb, fin, fout):
        stdv = 1.0 / jnp.sqrt(jnp.float32(fout))
        w = jax.random.uniform(kw, (fin, fout), jnp.float32, -stdv, stdv)
        b = jax.random.uniform(kb, (fout,), jnp.float32, -stdv, stdv)
        return w, b

    def lin_init(kw, kb, fin, fout):
        bound = 1.0 / jnp.sqrt(jnp.float32(fin))
        w = jax.random.uniform(kw, (fout, fin), jnp.float32, -bound, bound)
        b = jax.random.uniform(kb, (fout,), jnp.float32, -bound, bound)
        return w, b

    p = {}
    p["gc1_w"], p["gc1_b"] = gc_init(ks[0], ks[1], nfeat, nhid)
    p["gc2_w"], p["gc2_b"] = gc_init(ks[2], ks[3], nhid, nclass)
    p["gc3_w"], p["gc3_b"] = gc_init(ks[4], ks[5], nhid, nhid)
    p["fc3_w"], p["fc3_b"] = lin_init(ks[6], ks[7], nclass, 128)
    p["fc6_w"], p["fc6_b"] = lin_init(ks[8], ks[9], nhid, nclass)
    # fc4 / fc5 only used by .projection(); not part of forward.
    p["fc4_w"], p["fc4_b"] = lin_init(ks[10], ks[11], nhid, nhid)
    p["fc5_w"], p["fc5_b"] = lin_init(ks[12], ks[13], nhid, nhid)
    return p


def prepare_params(params, nfeat, nhid, nclass):
    """One-time: pad to lane multiples, cast matmul operands to bf16,
    transpose Linear weights to [in, out]."""
    nfeat_p = _round_up(nfeat, LANE)
    nhid_p = _round_up(nhid, LANE)
    nclass_p = _round_up(nclass, LANE)
    fc3_out = 128
    fc3_out_p = _round_up(fc3_out, LANE)

    def pad_w(w, fin_p, fout_p):
        return _pad2d(w, fin_p, fout_p).astype(jnp.bfloat16)

    def pad_b(b, fout_p):
        return jnp.pad(b, (0, fout_p - b.shape[0])).reshape(1, fout_p).astype(jnp.float32)

    pp = {}
    pp["gc1_w"] = pad_w(params["gc1_w"], nfeat_p, nhid_p)
    pp["gc1_b"] = pad_b(params["gc1_b"], nhid_p)
    pp["gc2_w"] = pad_w(params["gc2_w"], nhid_p, nclass_p)
    pp["gc2_b"] = pad_b(params["gc2_b"], nclass_p)
    pp["gc3_w"] = pad_w(params["gc3_w"], nhid_p, nhid_p)
    pp["gc3_b"] = pad_b(params["gc3_b"], nhid_p)
    pp["fc3_w"] = pad_w(jnp.transpose(params["fc3_w"]), nclass_p, fc3_out_p)
    pp["fc3_b"] = pad_b(params["fc3_b"], fc3_out_p)
    pp["fc6_w"] = pad_w(jnp.transpose(params["fc6_w"]), nhid_p, nclass_p)
    pp["fc6_b"] = pad_b(params["fc6_b"], nclass_p)
    pp["cfg"] = dict(nfeat=nfeat, nhid=nhid, nclass=nclass,
                     nfeat_p=nfeat_p, nhid_p=nhid_p, nclass_p=nclass_p,
                     fc3_out=fc3_out, fc3_out_p=fc3_out_p)
    return pp


# ---------------------------------------------------------------------------
# GCN.forward  (dropout is identity: module evaluated with training=False)
# ---------------------------------------------------------------------------

def gcn_forward(pp, x, adj, encoder_type=0):
    # TODO(synk): F.dropout(training=True) path not implemented (eval => identity).
    cfg = pp["cfg"]
    n_p = _round_up(x.shape[0], LANE)
    out_p = cfg["fc3_out_p"] if encoder_type == 0 else cfg["nhid_p"]
    if _fused_vmem_bytes(n_p, cfg, out_p) <= _vmem_budget_bytes():
        return _fused_forward(pp, x, adj, encoder_type)
    return _tiled_forward(pp, x, adj, encoder_type)


# ---------------------------------------------------------------------------
# Pure-JAX f32 reference (mirrors the PyTorch module in eval mode)
# ---------------------------------------------------------------------------

def gcn_forward_ref(params, x, adj, encoder_type):
    def gc(inp, w, b):
        return adj @ (inp @ w) + b
    relu = lambda v: jnp.maximum(v, 0.0)
    if encoder_type == 0:
        h = relu(gc(x, params["gc1_w"], params["gc1_b"]))
        xx = gc(h, params["gc2_w"], params["gc2_b"])
        out = relu(xx) @ params["fc3_w"].T + params["fc3_b"]
    elif encoder_type == 1:
        h = relu(gc(x, params["gc1_w"], params["gc1_b"]))
        out = gc(h, params["gc3_w"], params["gc3_b"])
        xx = relu(out) @ params["fc6_w"].T + params["fc6_b"]
    elif encoder_type == 2:
        out = gc(x, params["gc1_w"], params["gc1_b"])
        xx = gc(relu(out), params["gc2_w"], params["gc2_b"])
    else:
        h = relu(gc(x, params["gc1_w"], params["gc1_b"]))
        out = adj @ h
        xx = out @ params["fc6_w"].T + params["fc6_b"]
    return jax.nn.log_softmax(xx, axis=1), out


# ---------------------------------------------------------------------------
# Demo
# ---------------------------------------------------------------------------

def _make_adj(key, n):
    a = (jax.random.uniform(key, (n, n)) > 0.6).astype(jnp.float32)
    a = jnp.maximum(a, a.T) + jnp.eye(n, dtype=jnp.float32)
    deg = jnp.sum(a, axis=1, keepdims=True)
    return a / deg


if __name__ == "__main__":
    N, NFEAT, NHID, NCLASS = 8, 16, 32, 8

    key = jax.random.PRNGKey(0)
    k_x, k_a, k_p, k_x2, k_a2 = jax.random.split(key, 5)

    x = jax.random.normal(k_x, (N, NFEAT), jnp.float32)
    adj = _make_adj(k_a, N)

    raw_params = init_params(k_p, NFEAT, NHID, NCLASS)
    pp = prepare_params(raw_params, NFEAT, NHID, NCLASS)

    out_dims = {0: 128, 1: NHID, 2: NHID, 3: NHID}
    TOL = 0.15  # bf16 operand rounding vs f32 reference

    def check(tag, got, want):
        err = float(jnp.max(jnp.abs(got - want)))
        assert err < TOL, f"{tag}: max abs err {err}"

    # Small graph: fused single-kernel path (adj streamed chunk-wise into VMEM).
    for enc in (0, 1, 2, 3):
        lp, out = gcn_forward(pp, x, adj, encoder_type=enc)
        jax.block_until_ready(lp)
        jax.block_until_ready(out)
        assert lp.shape == (N, NCLASS)
        assert out.shape == (N, out_dims[enc])
        assert bool(jnp.all(jnp.isfinite(lp)))
        assert bool(jnp.all(jnp.isfinite(out)))
        lp_r, out_r = gcn_forward_ref(raw_params, x, adj, enc)
        check(f"fused lp enc={enc}", lp, lp_r)
        check(f"fused out enc={enc}", out, out_r)

    # Larger graph: tiled grid path (resident support, f32 k-accumulation, fused
    # log_softmax finalize).  Small tiles force row- and k-grids > 1.
    N2 = 512
    x2 = jax.random.normal(k_x2, (N2, NFEAT), jnp.float32)
    adj2 = _make_adj(k_a2, N2)
    for enc in (0, 1, 2, 3):
        lp2, out2 = _tiled_forward(pp, x2, adj2, encoder_type=enc,
                                   tm=256, tk_cap=256)
        jax.block_until_ready(lp2)
        jax.block_until_ready(out2)
        assert lp2.shape == (N2, NCLASS)
        assert out2.shape == (N2, out_dims[enc])
        lp_r, out_r = gcn_forward_ref(raw_params, x2, adj2, enc)
        check(f"tiled lp enc={enc}", lp2, lp_r)
        check(f"tiled out enc={enc}", out2, out_r)

    # Default (large-tile) tiled configuration once as well.
    lp3, out3 = _tiled_forward(pp, x2, adj2, encoder_type=0)
    jax.block_until_ready(lp3)
    lp_r, out_r = gcn_forward_ref(raw_params, x2, adj2, 0)
    check("tiled-default lp", lp3, lp_r)
    check("tiled-default out", out3, out_r)

    print("KERNEL_OK")
</pallas_src>

<mosaic_0001>
module attributes {stable_mosaic.version = 11 : i64} {
  func.func @_fused_forward_kernel(%arg0: memref<128x128xbf16, #tpu.memory_space<vmem>>, %arg1: memref<128x128xbf16, #tpu.memory_space<any>>, %arg2: memref<128x128xbf16, #tpu.memory_space<vmem>>, %arg3: memref<1x128xf32, #tpu.memory_space<vmem>>, %arg4: memref<128x128xbf16, #tpu.memory_space<vmem>>, %arg5: memref<1x128xf32, #tpu.memory_space<vmem>>, %arg6: memref<128x128xbf16, #tpu.memory_space<vmem>>, %arg7: memref<1x128xf32, #tpu.memory_space<vmem>>, %arg8: memref<128x128xf32, #tpu.memory_space<vmem>>, %arg9: memref<128x128xf32, #tpu.memory_space<vmem>>, %arg10: memref<128x128xbf16, #tpu.memory_space<vmem>>, %arg11: memref<128x128xf32, #tpu.memory_space<vmem>>, %arg12: memref<1x!tpu.dma_semaphore, #tpu.memory_space<semaphore_mem>>) attributes {dimension_semantics = [], scalar_prefetch = 0 : i64, scratch_operands = 3 : i64, tpu.core_type = #tpu.core_type<tc>} {
    %c0_i32 = arith.constant 0 : i32
    %c0_i32_0 = arith.constant 0 : i32
    %c0_i32_1 = arith.constant 0 : i32
    %0 = tpu.memref_slice %arg1[%c0_i32_0, %c0_i32_1] : memref<128x128xbf16, #tpu.memory_space<any>> -> memref<128x128xbf16, #tpu.memory_space<any>>
    %c0_i32_2 = arith.constant 0 : i32
    %c0_i32_3 = arith.constant 0 : i32
    %1 = tpu.memref_slice %arg10[%c0_i32_2, %c0_i32_3] : memref<128x128xbf16, #tpu.memory_space<vmem>> -> memref<128x128xbf16, #tpu.memory_space<vmem>>
    %2 = tpu.memref_slice %arg12[%c0_i32] : memref<1x!tpu.dma_semaphore, #tpu.memory_space<semaphore_mem>> -> memref<1x!tpu.dma_semaphore, #tpu.memory_space<semaphore_mem>>
    %3 = tpu.memref_squeeze %2 : memref<1x!tpu.dma_semaphore, #tpu.memory_space<semaphore_mem>> -> memref<!tpu.dma_semaphore, #tpu.memory_space<semaphore_mem>>
    tpu.enqueue_dma source(%0 : memref<128x128xbf16, #tpu.memory_space<any>>) target(%1 : memref<128x128xbf16, #tpu.memory_space<vmem>>) target_semaphore(%3 : memref<!tpu.dma_semaphore, #tpu.memory_space<semaphore_mem>>)
    %c0 = arith.constant 0 : index
    %c0_4 = arith.constant 0 : index
    %4 = vector.load %arg0[%c0, %c0_4] : memref<128x128xbf16, #tpu.memory_space<vmem>>, vector<128x128xbf16>
    %c0_5 = arith.constant 0 : index
    %c0_6 = arith.constant 0 : index
    %5 = vector.load %arg2[%c0_5, %c0_6] : memref<128x128xbf16, #tpu.memory_space<vmem>>, vector<128x128xbf16>
    %cst = arith.constant dense<0.000000e+00> : vector<128x128xf32>
    %6 = tpu.matmul %4, %5, %cst {dimension_numbers = #tpu.dot_dimension_numbers<[1], [0], [0], [1], [0, 0, 1, 1], [], []>} : vector<128x128xbf16>, vector<128x128xbf16>, vector<128x128xf32> -> vector<128x128xf32>
    %7 = arith.truncf %6 : vector<128x128xf32> to vector<128x128xbf16>
    %c0_7 = arith.constant 0 : index
    %c0_8 = arith.constant 0 : index
    %8 = vector.load %arg3[%c0_7, %c0_8] : memref<1x128xf32, #tpu.memory_space<vmem>>, vector<1x128xf32>
    %c0_i32_9 = arith.constant 0 : i32
    %c0_i32_10 = arith.constant 0 : i32
    %c0_i32_11 = arith.constant 0 : i32
    %9 = tpu.memref_slice %arg1[%c0_i32_10, %c0_i32_11] : memref<128x128xbf16, #tpu.memory_space<any>> -> memref<128x128xbf16, #tpu.memory_space<any>>
    %c0_i32_12 = arith.constant 0 : i32
    %c0_i32_13 = arith.constant 0 : i32
    %10 = tpu.memref_slice %arg10[%c0_i32_12, %c0_i32_13] : memref<128x128xbf16, #tpu.memory_space<vmem>> -> memref<128x128xbf16, #tpu.memory_space<vmem>>
    %11 = tpu.memref_slice %arg12[%c0_i32_9] : memref<1x!tpu.dma_semaphore, #tpu.memory_space<semaphore_mem>> -> memref<1x!tpu.dma_semaphore, #tpu.memory_space<semaphore_mem>>
    %12 = tpu.memref_squeeze %11 : memref<1x!tpu.dma_semaphore, #tpu.memory_space<semaphore_mem>> -> memref<!tpu.dma_semaphore, #tpu.memory_space<semaphore_mem>>
    tpu.wait_dma2 semaphore(%12 : memref<!tpu.dma_semaphore, #tpu.memory_space<semaphore_mem>>) src(%9 : memref<128x128xbf16, #tpu.memory_space<any>>) dst(%10 : memref<128x128xbf16, #tpu.memory_space<vmem>>)
    %c0_14 = arith.constant 0 : index
    %c0_15 = arith.constant 0 : index
    %13 = vector.load %arg10[%c0_14, %c0_15] : memref<128x128xbf16, #tpu.memory_space<vmem>>, vector<128x128xbf16>
    %cst_16 = arith.constant dense<0.000000e+00> : vector<128x128xf32>
    %14 = tpu.matmul %13, %7, %cst_16 {dimension_numbers = #tpu.dot_dimension_numbers<[1], [0], [0], [1], [0, 0, 1, 1], [], []>} : vector<128x128xbf16>, vector<128x128xbf16>, vector<128x128xf32> -> vector<128x128xf32>
    %15 = vector.broadcast %8 : vector<1x128xf32> to vector<128x128xf32>
    %16 = arith.addf %14, %15 : vector<128x128xf32>
    %c0_17 = arith.constant 0 : index
    %c0_18 = arith.constant 0 : index
    %17 = vector.load %arg11[%c0_17, %c0_18] : memref<128x128xf32, #tpu.memory_space<vmem>>, vector<128x128xf32>
    tpu.vector_store %arg11[%c0_17, %c0_18], %16 {strides = array<i32>} : memref<128x128xf32, #tpu.memory_space<vmem>>, vector<128x128xf32>,
    %c0_19 = arith.constant 0 : index
    %c0_20 = arith.constant 0 : index
    %18 = vector.load %arg11[%c0_19, %c0_20] : memref<128x128xf32, #tpu.memory_space<vmem>>, vector<128x128xf32>
    %cst_21 = arith.constant 0.000000e+00 : f32
    %19 = vector.broadcast %cst_21 : f32 to vector<128x128xf32>
    %20 = arith.maximumf %18, %19 : vector<128x128xf32>
    %21 = arith.truncf %20 : vector<128x128xf32> to vector<128x128xbf16>
    %c0_22 = arith.constant 0 : index
    %c0_23 = arith.constant 0 : index
    %22 = vector.load %arg4[%c0_22, %c0_23] : memref<128x128xbf16, #tpu.memory_space<vmem>>, vector<128x128xbf16>
    %cst_24 = arith.constant dense<0.000000e+00> : vector<128x128xf32>
    %23 = tpu.matmul %21, %22, %cst_24 {dimension_numbers = #tpu.dot_dimension_numbers<[1], [0], [0], [1], [0, 0, 1, 1], [], []>} : vector<128x128xbf16>, vector<128x128xbf16>, vector<128x128xf32> -> vector<128x128xf32>
    %c0_25 = arith.constant 0 : index
    %c0_26 = arith.constant 0 : index
    %24 = vector.load %arg10[%c0_25, %c0_26] : memref<128x128xbf16, #tpu.memory_space<vmem>>, vector<128x128xbf16>
    %25 = arith.truncf %23 : vector<128x128xf32> to vector<128x128xbf16>
    %cst_27 = arith.constant dense<0.000000e+00> : vector<128x128xf32>
    %26 = tpu.matmul %24, %25, %cst_27 {dimension_numbers = #tpu.dot_dimension_numbers<[1], [0], [0], [1], [0, 0, 1, 1], [], []>} : vector<128x128xbf16>, vector<128x128xbf16>, vector<128x128xf32> -> vector<128x128xf32>
    %c0_28 = arith.constant 0 : index
    %c0_29 = arith.constant 0 : index
    %27 = vector.load %arg5[%c0_28, %c0_29] : memref<1x128xf32, #tpu.memory_space<vmem>>, vector<1x128xf32>
    %28 = vector.broadcast %27 : vector<1x128xf32> to vector<128x128xf32>
    %29 = arith.addf %26, %28 : vector<128x128xf32>
    %cst_30 = arith.constant 0.000000e+00 : f32
    %30 = vector.broadcast %cst_30 : f32 to vector<128x128xf32>
    %31 = arith.maximumf %29, %30 : vector<128x128xf32>
    %32 = arith.truncf %31 : vector<128x128xf32> to vector<128x128xbf16>
    %c0_31 = arith.constant 0 : index
    %c0_32 = arith.constant 0 : index
    %33 = vector.load %arg6[%c0_31, %c0_32] : memref<128x128xbf16, #tpu.memory_space<vmem>>, vector<128x128xbf16>
    %cst_33 = arith.constant dense<0.000000e+00> : vector<128x128xf32>
    %34 = tpu.matmul %32, %33, %cst_33 {dimension_numbers = #tpu.dot_dimension_numbers<[1], [0], [0], [1], [0, 0, 1, 1], [], []>} : vector<128x128xbf16>, vector<128x128xbf16>, vector<128x128xf32> -> vector<128x128xf32>
    %c0_34 = arith.constant 0 : index
    %c0_35 = arith.constant 0 : index
    %35 = vector.load %arg7[%c0_34, %c0_35] : memref<1x128xf32, #tpu.memory_space<vmem>>, vector<1x128xf32>
    %36 = vector.broadcast %35 : vector<1x128xf32> to vector<128x128xf32>
    %37 = arith.addf %34, %36 : vector<128x128xf32>
    %38 = tpu.iota {dimensions = array<i32: 1>} : vector<128x128xi32>
    %c8_i32 = arith.constant 8 : i32
    %39 = vector.broadcast %c8_i32 : i32 to vector<128x128xi32>
    %40 = arith.cmpi slt, %38, %39 : vector<128x128xi32>
    %cst_36 = arith.constant -1.000000e+30 : f32
    %41 = vector.broadcast %cst_36 : f32 to vector<128x128xf32>
    %42 = arith.select %40, %29, %41 : vector<128x128xi1>, vector<128x128xf32>
    %cst_37 = arith.constant dense<0xFF800000> : vector<128xf32>
    %43 = vector.multi_reduction <maximumf>, %42, %cst_37 [1] : vector<128x128xf32> to vector<128xf32>
    %44 = vector.shape_cast %43 : vector<128xf32> to vector<128x1xf32>
    %45 = vector.broadcast %44 : vector<128x1xf32> to vector<128x128xf32>
    %46 = arith.subf %42, %45 : vector<128x128xf32>
    %47 = math.exp %46 : vector<128x128xf32>
    %cst_38 = arith.constant dense<0.000000e+00> : vector<128xf32>
    %48 = vector.multi_reduction <add>, %47, %cst_38 [1] : vector<128x128xf32> to vector<128xf32>
    %49 = vector.shape_cast %48 : vector<128xf32> to vector<128x1xf32>
    %50 = math.log %49 : vector<128x1xf32>
    %51 = vector.broadcast %50 : vector<128x1xf32> to vector<128x128xf32>
    %52 = arith.subf %46, %51 : vector<128x128xf32>
    %c0_39 = arith.constant 0 : index
    %c0_40 = arith.constant 0 : index
    %53 = vector.load %arg8[%c0_39, %c0_40] : memref<128x128xf32, #tpu.memory_space<vmem>>, vector<128x128xf32>
    tpu.vector_store %arg8[%c0_39, %c0_40], %52 {strides = array<i32>} : memref<128x128xf32, #tpu.memory_space<vmem>>, vector<128x128xf32>,
    %c0_41 = arith.constant 0 : index
    %c0_42 = arith.constant 0 : index
    %54 = vector.load %arg9[%c0_41, %c0_42] : memref<128x128xf32, #tpu.memory_space<vmem>>, vector<128x128xf32>
    tpu.vector_store %arg9[%c0_41, %c0_42], %37 {strides = array<i32>} : memref<128x128xf32, #tpu.memory_space<vmem>>, vector<128x128xf32>,
    return
  }
}

</mosaic_0001>

<bundles_post_ra>
// kernel: tpu_custom_call.1
= control target key start
LH: loop header
LB: loop body
LE: loop exit
PB: predicated region body
PF: predicated region fallthrough
CT: control target
= control target key end

     0   :  { %15 = vsyncpa [#allocation6], 0  ;;  %s2188_s0 = inlined_call_operand.hbm [shape: bf16[128,128], index: 0, kind: input, shape index: {}]   ;;  %s2189_s1 = inlined_call_operand.hbm [shape: bf16[128,128], index: 1, kind: input, shape index: {}]   ;;  %s2190_s2 = inlined_call_operand.hbm [shape: bf16[128,128], index: 2, kind: input, shape index: {}]   ;;  %s2191_s3 = inlined_call_operand.vmem [shape: f32[1,128], index: 3, kind: input, shape index: {}]   ;;  %s2192_s4 = inlined_call_operand.hbm [shape: bf16[128,128], index: 4, kind: input, shape index: {}]   ;;  %s2193_s5 = inlined_call_operand.vmem [shape: f32[1,128], index: 5, kind: input, shape index: {}]   ;;  %s2194_s6 = inlined_call_operand.hbm [shape: bf16[128,128], index: 6, kind: input, shape index: {}]   ;;  %s2195_s7 = inlined_call_operand.vmem [shape: f32[1,128], index: 7, kind: input, shape index: {}]   ;;  %s2196_s8 = inlined_call_operand.hbm [shape: f32[128,128], index: 8, kind: output, shape index: {0}]   ;;  %s2197_s9 = inlined_call_operand.hbm [shape: f32[128,128], index: 9, kind: output, shape index: {1}]  }
   0x1   :  { %16 = vsyncpa [#allocation9], 0 }
   0x2   :  { %17 = vsyncpa [#allocation12], 0 }
   0x3   :  { %18 = vsyncpa [#allocation7], 0 }
   0x4   :  { %19 = vsyncpa [#allocation15], 0  ;;  %s1793_s30 = smov [#allocation8]   ;;  %s1794_s11 = smov [#allocation5]  }
   0x5   :  { %s37_s10 = sshll.u32 %s1793_s30, 4  ;;  %s25_s12 = sshll.u32 %s1794_s11, 4  ;;  %s38_s10 = int_to_ptr.vmem [resolvable:$true] %s37_s10  ;;  %s1854_s12 = int_to_ptr.vmem [resolvable:$true] %s25_s12 }
   0x6   :  { %s1627_s15 = scalar_lea.hbm %s2190_s2, 1024 }
   0x7   :  { %p1628_p0 = scmp.ne.s32.totalorder %s2190_s2, %s1627_s15  ;;  %p1631_p1 = scmp.lt.u32.totalorder %s1627_s15, %s2190_s2 }
   0x9   :  { %p1633_p2 = pnand %p1631_p1, %p1628_p0 }
   0xb   :  { %1636 = shalt.err (!%p1633_p2)
}
   0xc   :  { %s1637_s20 = scalar_lea.vmem %s38_s10, 1024  ;;  %p1642_p4 = scmp.lt.s32.totalorder %s38_s10, %s38_s10 }
   0xd   :  { %p1638_p3 = scmp.ne.s32.totalorder %s38_s10, %s1637_s20  ;;  %p1643_p5 = scmp.lt.s32.totalorder %s1637_s20, %s1637_s20 }
   0xf   :  { %p1644_p6 = por %p1643_p5, %p1642_p4 }
  0x11   :  { %p1645_p7 = pnand %p1644_p6, %p1638_p3 }
  0x13   :  { %1648 = shalt.err (!%p1645_p7)
}
  0x14   :  { %s1795_s21 = smov 64   ;;  %s1796_s22 = smov 4  }
  0x15   :  { %43 = dma.hbm_to_vmem [thread:$0]  %s2190_s2, 1024, %s38_s10, [#allocation9], %s1795_s21, %s1795_s21, %s1796_s22  }
  0x16   :  { %s1649_s27 = scalar_lea.hbm %s2188_s0, 1024 }
  0x17   :  { %p1650_p8 = scmp.ne.s32.totalorder %s2188_s0, %s1649_s27  ;;  %p1653_p9 = scmp.lt.u32.totalorder %s1649_s27, %s2188_s0 }
  0x19   :  { %p1655_p10 = pnand %p1653_p9, %p1650_p8 }
  0x1b   :  { %1658 = shalt.err (!%p1655_p10)
}
  0x1c   :  { %s1659_s13 = scalar_lea.vmem %s1854_s12, 1024  ;;  %p1664_p12 = scmp.lt.s32.totalorder %s1854_s12, %s1854_s12 }
  0x1d   :  { %p1660_p11 = scmp.ne.s32.totalorder %s1854_s12, %s1659_s13  ;;  %p1665_p13 = scmp.lt.s32.totalorder %s1659_s13, %s1659_s13 }
  0x1f   :  { %p1666_p0 = por %p1665_p13, %p1664_p12 }
  0x21   :  { %p1667_p1 = pnand %p1666_p0, %p1660_p11 }
  0x23   :  { %1670 = shalt.err (!%p1667_p1)
}
  0x24   :  { %31 = dma.hbm_to_vmem [thread:$0]  %s2188_s0, 1024, %s1854_s12, [#allocation6], %s1795_s21, %s1795_s21, %s1796_s22  }
  0x25   :  { %s1797_s14 = smov [#allocation10]   ;;  %s1798_s16 = smov [#allocation11]  }
  0x26   :  { %s51_s15 = sshll.u32 %s1797_s14, 4  ;;  %s65_s17 = sshll.u32 %s1798_s16, 4  ;;  %s52_s15 = int_to_ptr.vmem [resolvable:$true] %s51_s15  ;;  %s1891_s17 = int_to_ptr.vmem [resolvable:$true] %s65_s17 }
  0x27   :  { %s1671_s20 = scalar_lea.hbm %s2192_s4, 1024 }
  0x28   :  { %p1672_p2 = scmp.ne.s32.totalorder %s2192_s4, %s1671_s20  ;;  %p1675_p3 = scmp.lt.u32.totalorder %s1671_s20, %s2192_s4 }
  0x2a   :  { %p1677_p4 = pnand %p1675_p3, %p1672_p2 }
  0x2c   :  { %1680 = shalt.err (!%p1677_p4)
}
  0x2d   :  { %s1681_s0 = scalar_lea.vmem %s52_s15, 1024  ;;  %p1686_p6 = scmp.lt.s32.totalorder %s52_s15, %s52_s15 }
  0x2e   :  { %p1682_p5 = scmp.ne.s32.totalorder %s52_s15, %s1681_s0  ;;  %p1687_p7 = scmp.lt.s32.totalorder %s1681_s0, %s1681_s0 }
  0x30   :  { %p1688_p8 = por %p1687_p7, %p1686_p6 }
  0x32   :  { %p1689_p9 = pnand %p1688_p8, %p1682_p5 }
  0x34   :  { %1692 = shalt.err (!%p1689_p9)
}
  0x35   :  { %57 = dma.hbm_to_vmem [thread:$0]  %s2192_s4, 1024, %s52_s15, [#allocation9], %s1795_s21, %s1795_s21, %s1796_s22  }
  0x36   :  { %s1693_s30 = scalar_lea.hbm %s2194_s6, 1024 }
  0x37   :  { %p1694_p10 = scmp.ne.s32.totalorder %s2194_s6, %s1693_s30  ;;  %p1697_p11 = scmp.lt.u32.totalorder %s1693_s30, %s2194_s6 }
  0x39   :  { %p1699_p12 = pnand %p1697_p11, %p1694_p10 }
  0x3b   :  { %1702 = shalt.err (!%p1699_p12)
}
  0x3c   :  { %s1703_s14 = scalar_lea.vmem %s1891_s17, 1024  ;;  %p1708_p0 = scmp.lt.s32.totalorder %s1891_s17, %s1891_s17 }
  0x3d   :  { %p1704_p13 = scmp.ne.s32.totalorder %s1891_s17, %s1703_s14  ;;  %p1709_p1 = scmp.lt.s32.totalorder %s1703_s14, %s1703_s14 }
  0x3f   :  { %p1710_p2 = por %p1709_p1, %p1708_p0 }
  0x41   :  { %p1711_p3 = pnand %p1710_p2, %p1704_p13 }
  0x43   :  { %1714 = shalt.err (!%p1711_p3)
}
  0x44   :  { %71 = dma.hbm_to_vmem [thread:$0]  %s2194_s6, 1024, %s1891_s17, [#allocation12], %s1795_s21, %s1795_s21, %s1796_s22  }
  0x45   :  { %1781 = dma.done.wait [#allocation6], 1024  }
  0x46   :  { %1782 = vsyncadd [#allocation6], 4294966272 }
  0x47   :  { %1783 = dma.done.wait [#allocation9], 2048  }
  0x48   :  { %1784 = vsyncadd [#allocation9], 4294965248 }
  0x49   :  { %1785 = dma.done.wait [#allocation12], 1024  }
  0x4a   :  { %1786 = vsyncadd [#allocation12], 4294966272  ;;  %v1531_v0 = vld [vmem:[#allocation8] sm:$0xff]   ;;  %v1532_v1 = vld [vmem:[#allocation8 + $0x8] sm:$0xff]   ;;  %s1799_s6 = smov [#allocation2]   ;;  %s1715_s17 = scalar_lea.hbm %s2189_s1, 1024 }
  0x4b   :  { %1344 = vmatprep.subr.bf16.mxu0 %v1531_v0  ;;  %v1533_v2 = vld [vmem:[#allocation8 + $0x10] sm:$0xff]   ;;  %v1534_v3 = vld [vmem:[#allocation8 + $0x18] sm:$0xff]   ;;  %v1539_v4 = vld [vmem:[#allocation5] sm:$0xff]   ;;  %s94_s21 = sshll.u32 %s1799_s6, 4  ;;  %p1716_p4 = scmp.ne.s32.totalorder %s2189_s1, %s1715_s17  ;;  %s95_s21 = int_to_ptr.vmem [resolvable:$true] %s94_s21 }
  0x4c   :  { %1345 = vmatpush3.bf16.msra.mxu0 %v1531_v0  ;;  %1360 = vmatprep.mubr.bf16.mxu0 %v1539_v4  ;;  %v1535_v5 = vld [vmem:[#allocation8 + $0x20] sm:$0xff]   ;;  %v1536_v6 = vld [vmem:[#allocation8 + $0x28] sm:$0xff]   ;;  %v1537_v7 = vld [vmem:[#allocation8 + $0x30] sm:$0xff]   ;;  %p1719_p5 = scmp.lt.u32.totalorder %s1715_s17, %s2189_s1 }
  0x4d   :  { %1346 = vmatprep.subr.bf16.mxu0 %v1532_v1  ;;  %v1538_v8 = vld [vmem:[#allocation8 + $0x38] sm:$0xff]   ;;  %v1540_v9 = vld [vmem:[#allocation5 + $0x8] sm:$0xff]   ;;  %v1541_v10 = vld [vmem:[#allocation5 + $0x10] sm:$0xff]  }
  0x4e   :  { %v1542_v11 = vld [vmem:[#allocation5 + $0x18] sm:$0xff]   ;;  %v1543_v12 = vld [vmem:[#allocation5 + $0x20] sm:$0xff]   ;;  %v1544_v13 = vld [vmem:[#allocation5 + $0x28] sm:$0xff]   ;;  %p1721_p6 = pnand %p1719_p5, %p1716_p4 }
  0x4f   :  { %v1545_v14 = vld [vmem:[#allocation5 + $0x30] sm:$0xff]   ;;  %v1546_v15 = vld [vmem:[#allocation5 + $0x38] sm:$0xff]  }
  0x50   :  { %1347 = vmatpush3.bf16.msra.mxu0 %v1532_v1 }
  0x51   :  { %1348 = vmatprep.subr.bf16.mxu0 %v1533_v2 }
  0x54   :  { %1349 = vmatpush3.bf16.msra.mxu0 %v1533_v2 }
  0x55   :  { %1350 = vmatprep.subr.bf16.mxu0 %v1534_v3 }
  0x58   :  { %1351 = vmatpush3.bf16.msra.mxu0 %v1534_v3 }
  0x59   :  { %1352 = vmatprep.subr.bf16.mxu0 %v1535_v5 }
  0x5c   :  { %1353 = vmatpush3.bf16.msra.mxu0 %v1535_v5 }
  0x5d   :  { %1354 = vmatprep.subr.bf16.mxu0 %v1536_v6 }
  0x60   :  { %1355 = vmatpush3.bf16.msra.mxu0 %v1536_v6 }
  0x61   :  { %1356 = vmatprep.subr.bf16.mxu0 %v1537_v7 }
  0x64   :  { %1357 = vmatpush3.bf16.msra.mxu0 %v1537_v7 }
  0x65   :  { %1358 = vmatprep.subr.bf16.mxu0 %v1538_v8 }
  0x68   :  { %1359 = vmatpush3.bf16.msra.mxu0 %v1538_v8 }
  0x6b   :  { %1361 = vmatmul.mubr.bf16.vlgmr.msra.gmra.mrb[0].mxu0 %v1540_v9 }
  0x6c   :  { %1364 = vmatprep.mubr.bf16.mxu0 %v1541_v10 }
  0x73   :  { %1365 = vmatmul.mubr.bf16.gmra.mrb[4].mxu0 %v1542_v11 }
  0x74   :  { %1368 = vmatprep.mubr.bf16.mxu0 %v1543_v12 }
  0x7b   :  { %1369 = vmatmul.mubr.bf16.gmra.mrb[8].mxu0 %v1544_v13 }
  0x7c   :  { %1372 = vmatprep.mubr.bf16.mxu0 %v1545_v14 }
  0x83   :  { %1373 = vmatmul.mubr.bf16.gmra.mrb[12].mxu0 %v1546_v15 }
  0x84   :  { %1724 = shalt.err (!%p1721_p6)  }
  0x85   :  { %s1725_s24 = scalar_lea.vmem %s95_s21, 1024  ;;  %p1730_p8 = scmp.lt.s32.totalorder %s95_s21, %s95_s21 }
  0x86   :  { %p1726_p7 = scmp.ne.s32.totalorder %s95_s21, %s1725_s24  ;;  %p1731_p9 = scmp.lt.s32.totalorder %s1725_s24, %s1725_s24 }
  0x88   :  { %p1732_p10 = por %p1731_p9, %p1730_p8 }
  0x8a   :  { %p1733_p11 = pnand %p1732_p10, %p1726_p7 }
  0x8c   :  { %1736 = shalt.err (!%p1733_p11)  }
  0x8d   :  { %97 = dma.hbm_to_vmem [thread:$0]  %s2189_s1, 1024, %s95_s21, [#allocation4] }
 0x13e   :  { %v1362_v16 = vpop.f32.mrb[0].mxu0 }
 0x13f   :  { %v260_v17 = vpop.f32.mrb[1].mxu0 }
 0x140   :  { %v1363_v18 = vpop.f32.mrb[2].mxu0 }
 0x141   :  { %v324_v19 = vpack.c.bf16 %v1363_v18, %v1362_v16  ;;  %v263_v20 = vpop.f32.mrb[3].mxu0 }
 0x142   :  { %v323_v21 = vpack.c.bf16 %v263_v20, %v260_v17 }
 0x144   :  { %1376 = vmatprep.subr.bf16.mxu1 %v323_v21 }
 0x146   :  { %v1366_v22 = vpop.f32.mrb[4].mxu0 }
 0x147   :  { %v276_v23 = vpop.f32.mrb[5].mxu0 }
 0x148   :  { %v1367_v24 = vpop.f32.mrb[6].mxu0 }
 0x149   :  { %v326_v25 = vpack.c.bf16 %v1367_v24, %v1366_v22  ;;  %v279_v26 = vpop.f32.mrb[7].mxu0 }
 0x14a   :  { %v325_v27 = vpack.c.bf16 %v279_v26, %v276_v23 }
 0x14e   :  { %v1370_v28 = vpop.f32.mrb[8].mxu0 }
 0x14f   :  { %v292_v29 = vpop.f32.mrb[9].mxu0 }
 0x150   :  { %v1371_v30 = vpop.f32.mrb[10].mxu0 }
 0x151   :  { %v328_v31 = vpack.c.bf16 %v1371_v30, %v1370_v28  ;;  %v295_v32 = vpop.f32.mrb[11].mxu0 }
 0x152   :  { %v327_v33 = vpack.c.bf16 %v295_v32, %v292_v29 }
 0x156   :  { %v1374_v34 = vpop.f32.mrb[12].mxu0 }
 0x157   :  { %v308_v35 = vpop.f32.mrb[13].mxu0 }
 0x158   :  { %v1375_v36 = vpop.f32.mrb[14].mxu0 }
 0x159   :  { %v330_v37 = vpack.c.bf16 %v1375_v36, %v1374_v34  ;;  %v311_v38 = vpop.f32.mrb[15].mxu0 }
 0x15a   :  { %v329_v39 = vpack.c.bf16 %v311_v38, %v308_v35 }
 0x15b   :  { %1787 = dma.done.wait [#allocation4], 1024 }
 0x15c   :  { %1788 = vsyncadd [#allocation4], 4294966272  ;;  %1377 = vmatpush3.bf16.msra.mxu1 %v323_v21  ;;  %v336_v40 = vld [vmem:[#allocation2] sm:$0xff]  ;;  %v1548_v42 = vld [vmem:[#allocation10 + $0x8] sm:$0xff]  }
 0x15d   :  { %1378 = vmatprep.subr.bf16.mxu1 %v324_v19  ;;  %1392 = vmatprep.mubr.bf16.mxu1 %v336_v40  ;;  %v1547_v41 = vld [vmem:[#allocation10] sm:$0xff]   ;;  %v1549_v43 = vld [vmem:[#allocation10 + $0x10] sm:$0xff]   ;;  %v1550_v44 = vld [vmem:[#allocation10 + $0x18] sm:$0xff]  }
 0x15e   :  { %1408 = vmatprep.subr.bf16.mxu0 %v1547_v41  ;;  %v1551_v45 = vld [vmem:[#allocation10 + $0x20] sm:$0xff]   ;;  %v1552_v46 = vld [vmem:[#allocation10 + $0x28] sm:$0xff]   ;;  %v1942_v48 = vld [vmem:[#allocation2 + $0x10] sm:$0xff] }
 0x15f   :  { %1409 = vmatpush3.bf16.msra.mxu0 %v1547_v41  ;;  %v1940_v47 = vld [vmem:[#allocation2 + $0x8] sm:$0xff]  ;;  %v1946_v49 = vld [vmem:[#allocation2 + $0x18] sm:$0xff]  ;;  %v1948_v50 = vld [vmem:[#allocation2 + $0x20] sm:$0xff] }
 0x160   :  { %1379 = vmatpush3.bf16.msra.mxu1 %v324_v19  ;;  %1410 = vmatprep.subr.bf16.mxu0 %v1548_v42  ;;  %v1952_v51 = vld [vmem:[#allocation2 + $0x28] sm:$0xff]  ;;  %v1954_v52 = vld [vmem:[#allocation2 + $0x30] sm:$0xff]  ;;  %v1958_v53 = vld [vmem:[#allocation2 + $0x38] sm:$0xff] }
 0x161   :  { %1380 = vmatprep.subr.bf16.mxu1 %v325_v27  ;;  %v1553_v54 = vld [vmem:[#allocation10 + $0x30] sm:$0xff]   ;;  %v1554_v55 = vld [vmem:[#allocation10 + $0x38] sm:$0xff]   ;;  %v1244_v56 = vld [vmem:[%s2191_s3] ss:$0 sm:$0xff] }
 0x163   :  { %1411 = vmatpush3.bf16.msra.mxu0 %v1548_v42 }
 0x164   :  { %1381 = vmatpush3.bf16.msra.mxu1 %v325_v27  ;;  %1412 = vmatprep.subr.bf16.mxu0 %v1549_v43 }
 0x165   :  { %1382 = vmatprep.subr.bf16.mxu1 %v326_v25 }
 0x167   :  { %1413 = vmatpush3.bf16.msra.mxu0 %v1549_v43 }
 0x168   :  { %1383 = vmatpush3.bf16.msra.mxu1 %v326_v25  ;;  %1414 = vmatprep.subr.bf16.mxu0 %v1550_v44 }
 0x169   :  { %1384 = vmatprep.subr.bf16.mxu1 %v327_v33 }
 0x16b   :  { %1415 = vmatpush3.bf16.msra.mxu0 %v1550_v44 }
 0x16c   :  { %1385 = vmatpush3.bf16.msra.mxu1 %v327_v33  ;;  %1416 = vmatprep.subr.bf16.mxu0 %v1551_v45 }
 0x16d   :  { %1386 = vmatprep.subr.bf16.mxu1 %v328_v31 }
 0x16f   :  { %1417 = vmatpush3.bf16.msra.mxu0 %v1551_v45 }
 0x170   :  { %1387 = vmatpush3.bf16.msra.mxu1 %v328_v31  ;;  %1418 = vmatprep.subr.bf16.mxu0 %v1552_v46 }
 0x171   :  { %1388 = vmatprep.subr.bf16.mxu1 %v329_v39 }
 0x173   :  { %1419 = vmatpush3.bf16.msra.mxu0 %v1552_v46 }
 0x174   :  { %1389 = vmatpush3.bf16.msra.mxu1 %v329_v39  ;;  %1420 = vmatprep.subr.bf16.mxu0 %v1553_v54 }
 0x175   :  { %1390 = vmatprep.subr.bf16.mxu1 %v330_v37 }
 0x177   :  { %1421 = vmatpush3.bf16.msra.mxu0 %v1553_v54 }
 0x178   :  { %1391 = vmatpush3.bf16.msra.mxu1 %v330_v37  ;;  %1422 = vmatprep.subr.bf16.mxu0 %v1554_v55 }
 0x17b   :  { %1393 = vmatmul.mubr.bf16.vlgmr.msra.gmra.mrb[0].mxu1 %v1940_v47  ;;  %1423 = vmatpush3.bf16.msra.mxu0 %v1554_v55 }
 0x17c   :  { %1396 = vmatprep.mubr.bf16.mxu1 %v1942_v48 }
 0x183   :  { %1397 = vmatmul.mubr.bf16.gmra.mrb[4].mxu1 %v1946_v49 }
 0x184   :  { %1400 = vmatprep.mubr.bf16.mxu1 %v1948_v50 }
 0x18b   :  { %1401 = vmatmul.mubr.bf16.gmra.mrb[8].mxu1 %v1952_v51 }
 0x18c   :  { %1404 = vmatprep.mubr.bf16.mxu1 %v1954_v52 }
 0x193   :  { %1405 = vmatmul.mubr.bf16.gmra.mrb[12].mxu1 %v1958_v53 }
 0x194   :  { %1456 = vmatprep.mubr.bf16.mxu1 %v336_v40 }
 0x24e   :  { %v1394_v57 = vpop.f32.mrb[0].mxu1 }
 0x24f   :  { %v393_v58 = vadd.f32 %v1394_v57, %v1244_v56  ;;  %v384_v59 = vpop.f32.mrb[1].mxu1  ;;  %v1555_v57 = vld [vmem:[#allocation11] sm:$0xff]  }
 0x250   :  { %v385_v60 = vadd.f32 %v1244_v56, %v384_v59  ;;  %v1395_v61 = vpop.f32.mrb[2].mxu1  ;;  %1472 = vmatprep.subr.bf16.mxu0 %v1555_v57  ;;  %v1557_v59 = vld [vmem:[#allocation11 + $0x10] sm:$0xff]  }
 0x251   :  { %v396_v62 = vadd.f32 %v1395_v61, %v1244_v56  ;;  %v387_v63 = vpop.f32.mrb[3].mxu1  ;;  %v481_v1 = vmax.f32 %v393_v58, 0.0  ;;  %v1556_v58 = vld [vmem:[#allocation11 + $0x8] sm:$0xff]  }
 0x252   :  { %v388_v0 = vadd.f32 %v1244_v56, %v387_v63  ;;  %v479_v3 = vmax.f32 %v385_v60, 0.0  ;;  %v1558_v60 = vld [vmem:[#allocation11 + $0x18] sm:$0xff]   ;;  %v1560_v61 = vld [vmem:[#allocation11 + $0x28] sm:$0xff]  }
 0x253   :  { %v482_v2 = vmax.f32 %v396_v62, 0.0 }
 0x254   :  { %v480_v4 = vmax.f32 %v388_v0, 0.0 }
 0x255   :  { %v496_v5 = vpack.c.bf16 %v482_v2, %v481_v1 }
 0x256   :  { %v1398_v6 = vpop.f32.mrb[4].mxu1  ;;  %v495_v7 = vpack.c.bf16 %v480_v4, %v479_v3 }
 0x257   :  { %v409_v8 = vadd.f32 %v1398_v6, %v1244_v56  ;;  %v400_v9 = vpop.f32.mrb[5].mxu1 }
 0x258   :  { %v401_v10 = vadd.f32 %v1244_v56, %v400_v9  ;;  %v1399_v11 = vpop.f32.mrb[6].mxu1  ;;  %1424 = vmatprep.mubr.bf16.mxu0 %v495_v7 }
 0x259   :  { %v412_v12 = vadd.f32 %v1399_v11, %v1244_v56  ;;  %v403_v13 = vpop.f32.mrb[7].mxu1  ;;  %1425 = vmatmul.mubr.bf16.vlgmr.msra.gmra.mrb[16].mxu0 %v496_v5  ;;  %v485_v15 = vmax.f32 %v409_v8, 0.0 }
 0x25a   :  { %v404_v14 = vadd.f32 %v1244_v56, %v403_v13  ;;  %v483_v17 = vmax.f32 %v401_v10, 0.0  ;;  %1473 = vmatpush3.bf16.msra.mxu0 %v1555_v57 }
 0x25b   :  { %v486_v16 = vmax.f32 %v412_v12, 0.0  ;;  %1474 = vmatprep.subr.bf16.mxu0 %v1556_v58 }
 0x25c   :  { %v484_v18 = vmax.f32 %v404_v14, 0.0 }
 0x25d   :  { %v498_v19 = vpack.c.bf16 %v486_v16, %v485_v15 }
 0x25e   :  { %v497_v20 = vpack.c.bf16 %v484_v18, %v483_v17  ;;  %v1402_v21 = vpop.f32.mrb[8].mxu1  ;;  %1475 = vmatpush3.bf16.msra.mxu0 %v1556_v58 }
 0x25f   :  { %v425_v22 = vadd.f32 %v1402_v21, %v1244_v56  ;;  %v416_v23 = vpop.f32.mrb[9].mxu1  ;;  %1476 = vmatprep.subr.bf16.mxu0 %v1557_v59 }
 0x260   :  { %v417_v24 = vadd.f32 %v1244_v56, %v416_v23  ;;  %v1403_v25 = vpop.f32.mrb[10].mxu1  ;;  %1428 = vmatprep.mubr.bf16.mxu0 %v497_v20 }
 0x261   :  { %v428_v26 = vadd.f32 %v1403_v25, %v1244_v56  ;;  %v419_v27 = vpop.f32.mrb[11].mxu1  ;;  %1429 = vmatmul.mubr.bf16.gmra.mrb[20].mxu0 %v498_v19  ;;  %v489_v29 = vmax.f32 %v425_v22, 0.0 }
 0x262   :  { %v420_v28 = vadd.f32 %v1244_v56, %v419_v27  ;;  %v487_v31 = vmax.f32 %v417_v24, 0.0  ;;  %1477 = vmatpush3.bf16.msra.mxu0 %v1557_v59 }
 0x263   :  { %v490_v30 = vmax.f32 %v428_v26, 0.0  ;;  %1478 = vmatprep.subr.bf16.mxu0 %v1558_v60 }
 0x264   :  { %v488_v32 = vmax.f32 %v420_v28, 0.0 }
 0x265   :  { %v500_v33 = vpack.c.bf16 %v490_v30, %v489_v29 }
 0x266   :  { %v499_v34 = vpack.c.bf16 %v488_v32, %v487_v31  ;;  %v1406_v35 = vpop.f32.mrb[12].mxu1  ;;  %1479 = vmatpush3.bf16.msra.mxu0 %v1558_v60 }
 0x267   :  { %v441_v36 = vadd.f32 %v1406_v35, %v1244_v56  ;;  %v432_v37 = vpop.f32.mrb[13].mxu1 }
 0x268   :  { %v433_v38 = vadd.f32 %v1244_v56, %v432_v37  ;;  %v1407_v39 = vpop.f32.mrb[14].mxu1  ;;  %1432 = vmatprep.mubr.bf16.mxu0 %v499_v34 }
 0x269   :  { %v444_v40 = vadd.f32 %v1407_v39, %v1244_v56  ;;  %v435_v41 = vpop.f32.mrb[15].mxu1  ;;  %1433 = vmatmul.mubr.bf16.gmra.mrb[24].mxu0 %v500_v33  ;;  %v493_v43 = vmax.f32 %v441_v36, 0.0 }
 0x26a   :  { %v436_v42 = vadd.f32 %v1244_v56, %v435_v41  ;;  %v491_v45 = vmax.f32 %v433_v38, 0.0  ;;  %v1559_v56 = vld [vmem:[#allocation11 + $0x20] sm:$0xff]  }
 0x26b   :  { %v494_v44 = vmax.f32 %v444_v40, 0.0  ;;  %1480 = vmatprep.subr.bf16.mxu0 %v1559_v56 }
 0x26c   :  { %v492_v46 = vmax.f32 %v436_v42, 0.0  ;;  %1481 = vmatpush3.bf16.msra.mxu0 %v1559_v56 }
 0x26d   :  { %v502_v54 = vpack.c.bf16 %v494_v44, %v493_v43  ;;  %1482 = vmatprep.subr.bf16.mxu0 %v1560_v61 }
 0x26e   :  { %v501_v55 = vpack.c.bf16 %v492_v46, %v491_v45 }
 0x270   :  { %1436 = vmatprep.mubr.bf16.mxu0 %v501_v55  ;;  %1483 = vmatpush3.bf16.msra.mxu0 %v1560_v61 }
 0x271   :  { %1437 = vmatmul.mubr.bf16.gmra.mrb[28].mxu0 %v502_v54 }
 0x32c   :  { %v1426_v62 = vpop.f32.mrb[16].mxu0 }
 0x32d   :  { %v601_v63 = vpop.f32.mrb[17].mxu0 }
 0x32e   :  { %v1427_v0 = vpop.f32.mrb[18].mxu0 }
 0x32f   :  { %v673_v1 = vpack.c.bf16 %v1427_v0, %v1426_v62  ;;  %v604_v2 = vpop.f32.mrb[19].mxu0 }
 0x330   :  { %v672_v3 = vpack.c.bf16 %v604_v2, %v601_v63 }
 0x332   :  { %1440 = vmatprep.subr.bf16.mxu1 %v672_v3 }
 0x333   :  { %1441 = vmatpush3.bf16.msra.mxu1 %v672_v3 }
 0x334   :  { %v1430_v4 = vpop.f32.mrb[20].mxu0  ;;  %1442 = vmatprep.subr.bf16.mxu1 %v673_v1 }
 0x335   :  { %v617_v5 = vpop.f32.mrb[21].mxu0 }
 0x336   :  { %v1431_v6 = vpop.f32.mrb[22].mxu0 }
 0x337   :  { %v675_v7 = vpack.c.bf16 %v1431_v6, %v1430_v4  ;;  %v620_v8 = vpop.f32.mrb[23].mxu0  ;;  %1443 = vmatpush3.bf16.msra.mxu1 %v673_v1 }
 0x338   :  { %v674_v9 = vpack.c.bf16 %v620_v8, %v617_v5 }
 0x33a   :  { %1444 = vmatprep.subr.bf16.mxu1 %v674_v9 }
 0x33b   :  { %1445 = vmatpush3.bf16.msra.mxu1 %v674_v9 }
 0x33c   :  { %v1434_v10 = vpop.f32.mrb[24].mxu0  ;;  %1446 = vmatprep.subr.bf16.mxu1 %v675_v7 }
 0x33d   :  { %v633_v11 = vpop.f32.mrb[25].mxu0 }
 0x33e   :  { %v1435_v12 = vpop.f32.mrb[26].mxu0 }
 0x33f   :  { %v677_v13 = vpack.c.bf16 %v1435_v12, %v1434_v10  ;;  %v636_v14 = vpop.f32.mrb[27].mxu0  ;;  %1447 = vmatpush3.bf16.msra.mxu1 %v675_v7 }
 0x340   :  { %v676_v15 = vpack.c.bf16 %v636_v14, %v633_v11 }
 0x342   :  { %1448 = vmatprep.subr.bf16.mxu1 %v676_v15 }
 0x343   :  { %1449 = vmatpush3.bf16.msra.mxu1 %v676_v15 }
 0x344   :  { %v1438_v16 = vpop.f32.mrb[28].mxu0  ;;  %1450 = vmatprep.subr.bf16.mxu1 %v677_v13 }
 0x345   :  { %v649_v17 = vpop.f32.mrb[29].mxu0 }
 0x346   :  { %v1439_v18 = vpop.f32.mrb[30].mxu0 }
 0x347   :  { %v679_v19 = vpack.c.bf16 %v1439_v18, %v1438_v16  ;;  %v652_v20 = vpop.f32.mrb[31].mxu0  ;;  %1451 = vmatpush3.bf16.msra.mxu1 %v677_v13 }
 0x348   :  { %v678_v21 = vpack.c.bf16 %v652_v20, %v649_v17 }
 0x34a   :  { %1452 = vmatprep.subr.bf16.mxu1 %v678_v21 }
 0x34b   :  { %1453 = vmatpush3.bf16.msra.mxu1 %v678_v21 }
 0x34c   :  { %1454 = vmatprep.subr.bf16.mxu1 %v679_v19 }
 0x34f   :  { %1455 = vmatpush3.bf16.msra.mxu1 %v679_v19 }
 0x350   :  { %1504 = vmatprep.subr.bf16.mxu1 %v1555_v57 }
 0x352   :  { %1457 = vmatmul.mubr.bf16.vlgmr.msra.gmra.mrb[16].mxu1 %v1940_v47  ;;  %v1561_v47 = vld [vmem:[#allocation11 + $0x30] sm:$0xff]  }
 0x353   :  { %1460 = vmatprep.mubr.bf16.mxu1 %v1942_v48  ;;  %1512 = vmatpush3.bf16.msra.mxu1 %v1555_v57  ;;  %v1562_v48 = vld [vmem:[#allocation11 + $0x38] sm:$0xff]  }
 0x354   :  { %1505 = vmatprep.subr.bf16.mxu1 %v1556_v58  ;;  %1484 = vmatprep.subr.bf16.mxu0 %v1561_v47 }
 0x355   :  { %1485 = vmatpush3.bf16.msra.mxu0 %v1561_v47 }
 0x356   :  { %1486 = vmatprep.subr.bf16.mxu0 %v1562_v48 }
 0x357   :  { %1513 = vmatpush3.bf16.msra.mxu1 %v1556_v58 }
 0x358   :  { %1506 = vmatprep.subr.bf16.mxu1 %v1557_v59 }
 0x359   :  { %1487 = vmatpush3.bf16.msra.mxu0 %v1562_v48 }
 0x35a   :  { %1461 = vmatmul.mubr.bf16.gmra.mrb[20].mxu1 %v1946_v49  ;;  %v976_v49 = vlaneseq }
 0x35b   :  { %1464 = vmatprep.mubr.bf16.mxu1 %v1948_v50  ;;  %1514 = vmatpush3.bf16.msra.mxu1 %v1557_v59 }
 0x35c   :  { %1507 = vmatprep.subr.bf16.mxu1 %v1558_v60  ;;  %v1971_v50 = vand.u32 127, %v976_v49 }
 0x35e   :  { %vm978_vm0 = vcmp.lt.s32.totalorder %v1971_v50, 8 }
 0x35f   :  { %1515 = vmatpush3.bf16.msra.mxu1 %v1558_v60 }
 0x360   :  { %1508 = vmatprep.subr.bf16.mxu1 %v1559_v56 }
 0x362   :  { %1465 = vmatmul.mubr.bf16.gmra.mrb[24].mxu1 %v1952_v51  ;;  %v1976_v51 = vld [vmem:[%s2193_s5] ss:$0 sm:$0xff] }
 0x363   :  { %1468 = vmatprep.mubr.bf16.mxu1 %v1954_v52  ;;  %1516 = vmatpush3.bf16.msra.mxu1 %v1559_v56 }
 0x364   :  { %1509 = vmatprep.subr.bf16.mxu1 %v1560_v61 }
 0x367   :  { %1517 = vmatpush3.bf16.msra.mxu1 %v1560_v61 }
 0x368   :  { %1510 = vmatprep.subr.bf16.mxu1 %v1561_v47 }
 0x36a   :  { %1469 = vmatmul.mubr.bf16.gmra.mrb[28].mxu1 %v1958_v53 }
 0x36b   :  { %1518 = vmatpush3.bf16.msra.mxu1 %v1561_v47 }
 0x36c   :  { %1511 = vmatprep.subr.bf16.mxu1 %v1562_v48 }
 0x36f   :  { %1519 = vmatpush3.bf16.msra.mxu1 %v1562_v48 }
 0x425   :  { %v1458_v52 = vpop.f32.mrb[16].mxu1 }
 0x426   :  { %v730_v53 = vadd.f32 %v1458_v52, %v1976_v51  ;;  %v721_v22 = vpop.f32.mrb[17].mxu1 }
 0x427   :  { %v722_v23 = vadd.f32 %v1976_v51, %v721_v22  ;;  %v1459_v24 = vpop.f32.mrb[18].mxu1 }
 0x428   :  { %v733_v25 = vadd.f32 %v1459_v24, %v1976_v51  ;;  %v724_v26 = vpop.f32.mrb[19].mxu1  ;;  %v1984_v27 = vsel %vm978_vm0, %v730_v53, -1e+30  ;;  %v786_v30 = vmax.f32 %v730_v53, 0.0 }
 0x429   :  { %v725_v28 = vadd.f32 %v1976_v51, %v724_v26  ;;  %999 = vmax.xlane.f32.xlu1 %v1984_v27  ;;  %v1990_v29 = vsel %vm978_vm0, %v722_v23, -1e+30  ;;  %v784_v32 = vmax.f32 %v722_v23, 0.0 }
 0x42a   :  { %v787_v31 = vmax.f32 %v733_v25, 0.0  ;;  %995 = vmax.xlane.f32.xlu0 %v1990_v29  ;;  %v1995_v35 = vsel %vm978_vm0, %v733_v25, -1e+30 }
 0x42b   :  { %v785_v33 = vmax.f32 %v725_v28, 0.0  ;;  %v2000_v37 = vsel %vm978_vm0, %v725_v28, -1e+30 }
 0x42c   :  { %v801_v34 = vpack.c.bf16 %v787_v31, %v786_v30 }
 0x42d   :  { %1001 = vmax.xlane.f32.xlu1 %v1995_v35  ;;  %v1462_v36 = vpop.f32.mrb[20].mxu1  ;;  %v800_v38 = vpack.c.bf16 %v785_v33, %v784_v32 }
 0x42e   :  { %v746_v39 = vadd.f32 %v1462_v36, %v1976_v51  ;;  %v737_v40 = vpop.f32.mrb[21].mxu1  ;;  %997 = vmax.xlane.f32.xlu0 %v2000_v37 }
 0x42f   :  { %v738_v41 = vadd.f32 %v1976_v51, %v737_v40  ;;  %v1463_v42 = vpop.f32.mrb[22].mxu1  ;;  %1488 = vmatprep.mubr.bf16.mxu0 %v800_v38 }
 0x430   :  { %v790_v43 = vmax.f32 %v746_v39, 0.0  ;;  %v749_v44 = vadd.f32 %v1463_v42, %v1976_v51  ;;  %v740_v45 = vpop.f32.mrb[23].mxu1  ;;  %1489 = vmatmul.mubr.bf16.vlgmr.msra.gmra.mrb[32].mxu0 %v801_v34  ;;  %v2008_v46 = vsel %vm978_vm0, %v746_v39, -1e+30 }
 0x431   :  { %v741_v54 = vadd.f32 %v1976_v51, %v740_v45  ;;  %v788_v58 = vmax.f32 %v738_v41, 0.0  ;;  %v2019_v61 = vsel %vm978_vm0, %v738_v41, -1e+30 }
 0x432   :  { %v791_v55 = vmax.f32 %v749_v44, 0.0  ;;  %1007 = vmax.xlane.f32.xlu0 %v2008_v46  ;;  %v2014_v57 = vsel %vm978_vm0, %v749_v44, -1e+30 }
 0x433   :  { %v789_v59 = vmax.f32 %v741_v54, 0.0  ;;  %1009 = vmax.xlane.f32.xlu1 %v2014_v57  ;;  %v2025_v1 = vsel %vm978_vm0, %v741_v54, -1e+30 }
 0x434   :  { %v803_v60 = vpack.c.bf16 %v791_v55, %v790_v43 }
 0x435   :  { %v1466_v56 = vpop.f32.mrb[24].mxu1  ;;  %v802_v62 = vpack.c.bf16 %v789_v59, %v788_v58 }
 0x436   :  { %v762_v63 = vadd.f32 %v1466_v56, %v1976_v51  ;;  %v753_v0 = vpop.f32.mrb[25].mxu1  ;;  %1003 = vmax.xlane.f32.xlu0 %v2019_v61 }
 0x437   :  { %v754_v2 = vadd.f32 %v1976_v51, %v753_v0  ;;  %v1467_v3 = vpop.f32.mrb[26].mxu1  ;;  %1005 = vmax.xlane.f32.xlu1 %v2025_v1  ;;  %1492 = vmatprep.mubr.bf16.mxu0 %v802_v62 }
 0x438   :  { %v794_v4 = vmax.f32 %v762_v63, 0.0  ;;  %v765_v5 = vadd.f32 %v1467_v3, %v1976_v51  ;;  %v756_v6 = vpop.f32.mrb[27].mxu1  ;;  %1493 = vmatmul.mubr.bf16.gmra.mrb[36].mxu0 %v803_v60  ;;  %v2032_v7 = vsel %vm978_vm0, %v762_v63, -1e+30 }
 0x439   :  { %v757_v8 = vadd.f32 %v1976_v51, %v756_v6  ;;  %v792_v11 = vmax.f32 %v754_v2, 0.0  ;;  %v2043_v15 = vsel %vm978_vm0, %v754_v2, -1e+30 }
 0x43a   :  { %v795_v9 = vmax.f32 %v765_v5, 0.0  ;;  %1015 = vmax.xlane.f32.xlu0 %v2032_v7  ;;  %v2038_v10 = vsel %vm978_vm0, %v765_v5, -1e+30 }
 0x43b   :  { %v793_v12 = vmax.f32 %v757_v8, 0.0  ;;  %1017 = vmax.xlane.f32.xlu1 %v2038_v10  ;;  %v2049_v19 = vsel %vm978_vm0, %v757_v8, -1e+30 }
 0x43c   :  { %v805_v13 = vpack.c.bf16 %v795_v9, %v794_v4 }
 0x43d   :  { %v1470_v14 = vpop.f32.mrb[28].mxu1  ;;  %v804_v16 = vpack.c.bf16 %v793_v12, %v792_v11 }
 0x43e   :  { %v778_v17 = vadd.f32 %v1470_v14, %v1976_v51  ;;  %v769_v18 = vpop.f32.mrb[29].mxu1  ;;  %1011 = vmax.xlane.f32.xlu0 %v2043_v15 }
 0x43f   :  { %v770_v20 = vadd.f32 %v1976_v51, %v769_v18  ;;  %v1471_v21 = vpop.f32.mrb[30].mxu1  ;;  %1496 = vmatprep.mubr.bf16.mxu1 %v804_v16  ;;  %1013 = vmax.xlane.f32.xlu1 %v2049_v19 }
 0x440   :  { %v798_v47 = vmax.f32 %v778_v17, 0.0  ;;  %v781_v48 = vadd.f32 %v1471_v21, %v1976_v51  ;;  %v772_v49 = vpop.f32.mrb[31].mxu1  ;;  %1497 = vmatmul.mubr.bf16.vlgmr.msra.gmra.mrb[32].mxu1 %v805_v13  ;;  %v2067_v28 = vsel %vm978_vm0, %v778_v17, -1e+30 }
 0x441   :  { %v773_v52 = vadd.f32 %v1976_v51, %v772_v49  ;;  %v2057_v53 = vsel %vm978_vm0, %v770_v20, -1e+30  ;;  %v796_v23 = vmax.f32 %v770_v20, 0.0 }
 0x442   :  { %v799_v22 = vmax.f32 %v781_v48, 0.0  ;;  %1019 = vmax.xlane.f32.xlu0 %v2057_v53  ;;  %v2072_v30 = vsel %vm978_vm0, %v781_v48, -1e+30 }
 0x443   :  { %v797_v24 = vmax.f32 %v773_v52, 0.0  ;;  %v2062_v25 = vsel %vm978_vm0, %v773_v52, -1e+30 }
 0x444   :  { %1021 = vmax.xlane.f32.xlu1 %v2062_v25  ;;  %v807_v26 = vpack.c.bf16 %v799_v22, %v798_v47 }
 0x445   :  { %v806_v51 = vpack.c.bf16 %v797_v24, %v796_v23 }
 0x446   :  { %1023 = vmax.xlane.f32.xlu0 %v2067_v28 }
 0x447   :  { %1500 = vmatprep.mubr.bf16.mxu1 %v806_v51 }
 0x448   :  { %1501 = vmatmul.mubr.bf16.gmra.mrb[36].mxu1 %v807_v26  ;;  %1025 = vmax.xlane.f32.xlu1 %v2072_v30 }
 0x4b6   :  { %v1000_v31 = vpop.xlane.xlu1 %999 }
 0x4b7   :  { %v2076_v32 = vsub.f32 %v1984_v27, %v1000_v31  ;;  %v996_v33 = vpop.xlane.xlu0 %995  ;;  %v1254_v31 = vld [vmem:[%s2195_s7] ss:$0 sm:$0xff]  ;;  %s1800_s7 = smov [#allocation14]  }
 0x4b8   :  { %v2079_v34 = vsub.f32 %v1990_v29, %v996_v33  ;;  %s1204_s28 = sshll.u32 %s1800_s7, 4  ;;  %s1205_s28 = int_to_ptr.vmem [resolvable:$true] %s1204_s28 }
 0x4b9   :  { %v1047_v36 = vmul.f32 1.442695, %v2076_v32  ;;  %s1737_s29 = scalar_lea.vmem %s1205_s28, 2048  ;;  %p1742_p13 = scmp.lt.s32.totalorder %s1205_s28, %s1205_s28 }
 0x4ba   :  { %v1043_v38 = vmul.f32 1.442695, %v2079_v34  ;;  %v1002_v39 = vpop.xlane.xlu1 %1001  ;;  %p1738_p12 = scmp.ne.s32.totalorder %s1205_s28, %s1737_s29  ;;  %p1743_p0 = scmp.lt.s32.totalorder %s1737_s29, %s1737_s29 }
 0x4bb   :  { %1563 = vpow2.f32 %v1047_v36  ;;  %v2084_v50 = vsub.f32 %v1995_v35, %v1002_v39  ;;  %v998_v40 = vpop.xlane.xlu0 %997 }
 0x4bc   :  { %v2087_v41 = vsub.f32 %v2000_v37, %v998_v40  ;;  %1565 = vpow2.f32 %v1043_v38  ;;  %p1744_p1 = por %p1743_p0, %p1742_p13 }
 0x4bd   :  { %v1049_v27 = vmul.f32 1.442695, %v2084_v50 }
 0x4be   :  { %v1045_v29 = vmul.f32 1.442695, %v2087_v41  ;;  %p1745_p2 = pnand %p1744_p1, %p1738_p12 }
 0x4bf   :  { %1567 = vpow2.f32 %v1049_v27  ;;  %v1008_v42 = vpop.xlane.xlu0 %1007 }
 0x4c0   :  { %v2092_v43 = vsub.f32 %v2008_v46, %v1008_v42  ;;  %v1010_v44 = vpop.xlane.xlu1 %1009  ;;  %1569 = vpow2.f32 %v1045_v29 }
 0x4c1   :  { %v2095_v45 = vsub.f32 %v2014_v57, %v1010_v44 }
 0x4c2   :  { %v1055_v35 = vmul.f32 1.442695, %v2092_v43 }
 0x4c3   :  { %v1057_v37 = vmul.f32 1.442695, %v2095_v45  ;;  %v1004_v54 = vpop.xlane.xlu0 %1003 }
 0x4c4   :  { %1571 = vpow2.f32 %v1055_v35  ;;  %v2100_v55 = vsub.f32 %v2019_v61, %v1004_v54  ;;  %v1006_v58 = vpop.xlane.xlu1 %1005 }
 0x4c5   :  { %v1564_v59 = vpop.eup %1563  ;;  %v2103_v60 = vsub.f32 %v2025_v1, %v1006_v58  ;;  %1573 = vpow2.f32 %v1057_v37 }
 0x4c6   :  { %v1051_v46 = vmul.f32 1.442695, %v2100_v55  ;;  %1079 = vadd.xlane.f32.xlu0 %v1564_v59  ;;  %v1566_v62 = vpop.eup %1565 }
 0x4c7   :  { %v1053_v57 = vmul.f32 1.442695, %v2103_v60  ;;  %v1016_v56 = vpop.xlane.xlu0 %1015 }
 0x4c8   :  { %1575 = vpow2.f32 %v1051_v46  ;;  %v2108_v63 = vsub.f32 %v2032_v7, %v1016_v56  ;;  %v1018_v0 = vpop.xlane.xlu1 %1017 }
 0x4c9   :  { %v1568_v61 = vpop.eup %1567  ;;  %v2111_v2 = vsub.f32 %v2038_v10, %v1018_v0  ;;  %1577 = vpow2.f32 %v1053_v57 }
 0x4ca   :  { %v1063_v1 = vmul.f32 1.442695, %v2108_v63  ;;  %1081 = vadd.xlane.f32.xlu1 %v1568_v61  ;;  %1075 = vadd.xlane.f32.xlu0 %v1566_v62  ;;  %v1570_v7 = vpop.eup %1569 }
 0x4cb   :  { %v1065_v3 = vmul.f32 1.442695, %v2111_v2  ;;  %v1012_v4 = vpop.xlane.xlu0 %1011 }
 0x4cc   :  { %1579 = vpow2.f32 %v1063_v1  ;;  %v2116_v5 = vsub.f32 %v2043_v15, %v1012_v4  ;;  %v1014_v6 = vpop.xlane.xlu1 %1013 }
 0x4cd   :  { %v2119_v8 = vsub.f32 %v2049_v19, %v1014_v6  ;;  %1581 = vpow2.f32 %v1065_v3 }
 0x4ce   :  { %v1572_v9 = vpop.eup %1571  ;;  %v1059_v10 = vmul.f32 1.442695, %v2116_v5  ;;  %1077 = vadd.xlane.f32.xlu1 %v1570_v7 }
 0x4cf   :  { %v1061_v11 = vmul.f32 1.442695, %v2119_v8  ;;  %1087 = vadd.xlane.f32.xlu0 %v1572_v9  ;;  %v1020_v12 = vpop.xlane.xlu0 %1019  ;;  %v1574_v14 = vpop.eup %1573 }
 0x4d0   :  { %1583 = vpow2.f32 %v1059_v10  ;;  %v2124_v13 = vsub.f32 %v2057_v53, %v1020_v12 }
 0x4d1   :  { %v1022_v15 = vpop.xlane.xlu1 %1021  ;;  %1585 = vpow2.f32 %v1061_v11 }
 0x4d2   :  { %v1576_v16 = vpop.eup %1575  ;;  %v1067_v17 = vmul.f32 1.442695, %v2124_v13  ;;  %v2128_v18 = vsub.f32 %v2062_v25, %v1022_v15  ;;  %1089 = vadd.xlane.f32.xlu1 %v1574_v14 }
 0x4d3   :  { %1083 = vadd.xlane.f32.xlu0 %v1576_v16  ;;  %v1024_v19 = vpop.xlane.xlu0 %1023  ;;  %v1578_v47 = vpop.eup %1577 }
 0x4d4   :  { %1587 = vpow2.f32 %v1067_v17  ;;  %v1069_v20 = vmul.f32 1.442695, %v2128_v18  ;;  %v2132_v21 = vsub.f32 %v2067_v28, %v1024_v19 }
 0x4d5   :  { %v1026_v48 = vpop.xlane.xlu1 %1025 }
 0x4d6   :  { %v1580_v49 = vpop.eup %1579  ;;  %1589 = vpow2.f32 %v1069_v20  ;;  %v1071_v52 = vmul.f32 1.442695, %v2132_v21  ;;  %v2136_v53 = vsub.f32 %v2072_v30, %v1026_v48  ;;  %1085 = vadd.xlane.f32.xlu1 %v1578_v47 }
 0x4d7   :  { %1095 = vadd.xlane.f32.xlu0 %v1580_v49  ;;  %v1582_v23 = vpop.eup %1581 }
 0x4d8   :  { %1591 = vpow2.f32 %v1071_v52  ;;  %v1073_v22 = vmul.f32 1.442695, %v2136_v53 }
 0x4da   :  { %v1584_v24 = vpop.eup %1583  ;;  %1593 = vpow2.f32 %v1073_v22  ;;  %1097 = vadd.xlane.f32.xlu1 %v1582_v23 }
 0x4db   :  { %1091 = vadd.xlane.f32.xlu0 %v1584_v24  ;;  %v1586_v25 = vpop.eup %1585 }
 0x4de   :  { %v1588_v26 = vpop.eup %1587  ;;  %1093 = vadd.xlane.f32.xlu1 %v1586_v25 }
 0x4df   :  { %1099 = vadd.xlane.f32.xlu0 %v1588_v26 }
 0x4e0   :  { %v1590_v28 = vpop.eup %1589 }
 0x4e2   :  { %v1592_v51 = vpop.eup %1591  ;;  %1101 = vadd.xlane.f32.xlu1 %v1590_v28 }
 0x4e3   :  { %1103 = vadd.xlane.f32.xlu0 %v1592_v51 }
 0x4e4   :  { %v1594_v30 = vpop.eup %1593 }
 0x4e6   :  { %1105 = vadd.xlane.f32.xlu1 %v1594_v30 }
 0x503   :  { %v1490_v33 = vpop.f32.mrb[32].mxu0 }
 0x504   :  { %v922_v36 = vadd.f32 %v1490_v33, %v1254_v31  ;;  %v913_v38 = vpop.f32.mrb[33].mxu0 }
 0x505   :  { %v914_v39 = vadd.f32 %v1254_v31, %v913_v38  ;;  %v1491_v40 = vpop.f32.mrb[34].mxu0 }
 0x506   :  { %1173 = vst [vmem:[#allocation14 + $0x10] sm:$0xff] %v922_v36  ;;  %v925_v27 = vadd.f32 %v1491_v40, %v1254_v31  ;;  %v916_v29 = vpop.f32.mrb[35].mxu0 }
 0x507   :  { %1171 = vst [vmem:[#allocation14] sm:$0xff] %v914_v39  ;;  %v917_v42 = vadd.f32 %v1254_v31, %v916_v29 }
 0x508   :  { %1174 = vst [vmem:[#allocation14 + $0x18] sm:$0xff] %v925_v27 }
 0x509   :  { %1172 = vst [vmem:[#allocation14 + $0x8] sm:$0xff] %v917_v42 }
 0x50b   :  { %v1494_v44 = vpop.f32.mrb[36].mxu0 }
 0x50c   :  { %v938_v35 = vadd.f32 %v1494_v44, %v1254_v31  ;;  %v929_v37 = vpop.f32.mrb[37].mxu0 }
 0x50d   :  { %v930_v54 = vadd.f32 %v1254_v31, %v929_v37  ;;  %v1495_v58 = vpop.f32.mrb[38].mxu0 }
 0x50e   :  { %1177 = vst [vmem:[#allocation14 + $0x30] sm:$0xff] %v938_v35  ;;  %v941_v59 = vadd.f32 %v1495_v58, %v1254_v31  ;;  %v932_v46 = vpop.f32.mrb[39].mxu0 }
 0x50f   :  { %1175 = vst [vmem:[#allocation14 + $0x20] sm:$0xff] %v930_v54  ;;  %v933_v57 = vadd.f32 %v1254_v31, %v932_v46 }
 0x510   :  { %1178 = vst [vmem:[#allocation14 + $0x38] sm:$0xff] %v941_v59 }
 0x511   :  { %1176 = vst [vmem:[#allocation14 + $0x28] sm:$0xff] %v933_v57 }
 0x513   :  { %v1498_v56 = vpop.f32.mrb[32].mxu1 }
 0x514   :  { %v954_v62 = vadd.f32 %v1498_v56, %v1254_v31  ;;  %v945_v0 = vpop.f32.mrb[33].mxu1 }
 0x515   :  { %v946_v61 = vadd.f32 %v1254_v31, %v945_v0  ;;  %v1499_v1 = vpop.f32.mrb[34].mxu1 }
 0x516   :  { %1181 = vst [vmem:[#allocation14 + $0x50] sm:$0xff] %v954_v62  ;;  %v957_v3 = vadd.f32 %v1499_v1, %v1254_v31  ;;  %v948_v4 = vpop.f32.mrb[35].mxu1 }
 0x517   :  { %1179 = vst [vmem:[#allocation14 + $0x40] sm:$0xff] %v946_v61  ;;  %v949_v6 = vadd.f32 %v1254_v31, %v948_v4 }
 0x518   :  { %1182 = vst [vmem:[#allocation14 + $0x58] sm:$0xff] %v957_v3 }
 0x519   :  { %1180 = vst [vmem:[#allocation14 + $0x48] sm:$0xff] %v949_v6 }
 0x51b   :  { %v1502_v7 = vpop.f32.mrb[36].mxu1 }
 0x51c   :  { %v970_v9 = vadd.f32 %v1502_v7, %v1254_v31  ;;  %v961_v10 = vpop.f32.mrb[37].mxu1 }
 0x51d   :  { %v962_v11 = vadd.f32 %v1254_v31, %v961_v10  ;;  %v1503_v12 = vpop.f32.mrb[38].mxu1 }
 0x51e   :  { %1185 = vst [vmem:[#allocation14 + $0x70] sm:$0xff] %v970_v9  ;;  %v973_v14 = vadd.f32 %v1503_v12, %v1254_v31  ;;  %v964_v15 = vpop.f32.mrb[39].mxu1 }
 0x51f   :  { %1183 = vst [vmem:[#allocation14 + $0x60] sm:$0xff] %v962_v11  ;;  %v965_v16 = vadd.f32 %v1254_v31, %v964_v15 }
 0x520   :  { %1186 = vst [vmem:[#allocation14 + $0x78] sm:$0xff] %v973_v14 }
 0x521   :  { %1184 = vst [vmem:[#allocation14 + $0x68] sm:$0xff] %v965_v16 }
 0x522   :  { %1748 = shalt.err (!%p1745_p2)
}
 0x523   :  { %s1749_s13 = scalar_lea.hbm %s2197_s9, 2048 }
 0x524   :  { %p1750_p3 = scmp.ne.s32.totalorder %s2197_s9, %s1749_s13  ;;  %p1753_p4 = scmp.lt.u32.totalorder %s1749_s13, %s2197_s9 }
 0x526   :  { %p1755_p5 = pnand %p1753_p4, %p1750_p3 }
 0x528   :  { %1758 = shalt.err (!%p1755_p5)
}
 0x529   :  { %s1801_s15 = smov 128   ;;  %s1802_s6 = smov 8  }
 0x52a   :  { %1210 = dma.vmem_to_hbm [thread:$0]  %s1205_s28, 2048, %s2197_s9, [#allocation15], %s1801_s15, %s1801_s15, %s1802_s6  }
 0x52b   :  { %s1803_s9 = smov [#allocation13]  }
 0x52c   :  { %s1192_s16 = sshll.u32 %s1803_s9, 4  ;;  %s1193_s16 = int_to_ptr.vmem [resolvable:$true] %s1192_s16 }
 0x52d   :  { %s1759_s17 = scalar_lea.vmem %s1193_s16, 2048  ;;  %p1764_p7 = scmp.lt.s32.totalorder %s1193_s16, %s1193_s16 }
 0x52e   :  { %p1760_p6 = scmp.ne.s32.totalorder %s1193_s16, %s1759_s17  ;;  %p1765_p8 = scmp.lt.s32.totalorder %s1759_s17, %s1759_s17 }
 0x530   :  { %p1766_p9 = por %p1765_p8, %p1764_p7 }
 0x532   :  { %p1767_p10 = pnand %p1766_p9, %p1760_p6 }
 0x553   :  { %v1080_v17 = vpop.xlane.xlu0 %1079 }
 0x554   :  { %1595 = vlog2.f32 %v1080_v17 }
 0x557   :  { %v1082_v19 = vpop.xlane.xlu1 %1081  ;;  %v1076_v20 = vpop.xlane.xlu0 %1075 }
 0x558   :  { %1597 = vlog2.f32 %v1082_v19 }
 0x559   :  { %1599 = vlog2.f32 %v1076_v20 }
 0x55b   :  { %v1078_v47 = vpop.xlane.xlu1 %1077 }
 0x55c   :  { %1601 = vlog2.f32 %v1078_v47  ;;  %v1088_v48 = vpop.xlane.xlu0 %1087 }
 0x55d   :  { %1603 = vlog2.f32 %v1088_v48 }
 0x55e   :  { %v1596_v49 = vpop.eup %1595 }
 0x55f   :  { %v1112_v52 = vmul.f32 0.6931472, %v1596_v49  ;;  %v1090_v22 = vpop.xlane.xlu1 %1089 }
 0x560   :  { %1605 = vlog2.f32 %v1090_v22  ;;  %v1084_v23 = vpop.xlane.xlu0 %1083 }
 0x561   :  { %v1141_v24 = vsub.f32 %v2076_v32, %v1112_v52  ;;  %1607 = vlog2.f32 %v1084_v23 }
 0x562   :  { %v1598_v25 = vpop.eup %1597 }
 0x563   :  { %v1600_v26 = vpop.eup %1599  ;;  %1157 = vst [vmem:[#allocation13 + $0x10] sm:$0xff] %v1141_v24  ;;  %v1114_v28 = vmul.f32 0.6931472, %v1598_v25  ;;  %v1086_v51 = vpop.xlane.xlu1 %1085 }
 0x564   :  { %v1108_v30 = vmul.f32 0.6931472, %v1600_v26  ;;  %1609 = vlog2.f32 %v1086_v51  ;;  %v1096_v31 = vpop.xlane.xlu0 %1095 }
 0x565   :  { %v1142_v33 = vsub.f32 %v2084_v50, %v1114_v28  ;;  %1611 = vlog2.f32 %v1096_v31 }
 0x566   :  { %v1602_v36 = vpop.eup %1601  ;;  %v1139_v38 = vsub.f32 %v2079_v34, %v1108_v30 }
 0x567   :  { %v1604_v39 = vpop.eup %1603  ;;  %1158 = vst [vmem:[#allocation13 + $0x18] sm:$0xff] %v1142_v33  ;;  %v1110_v40 = vmul.f32 0.6931472, %v1602_v36  ;;  %v1098_v27 = vpop.xlane.xlu1 %1097 }
 0x568   :  { %1155 = vst [vmem:[#allocation13] sm:$0xff] %v1139_v38  ;;  %v1120_v32 = vmul.f32 0.6931472, %v1604_v39  ;;  %1613 = vlog2.f32 %v1098_v27  ;;  %v1092_v29 = vpop.xlane.xlu0 %1091 }
 0x569   :  { %v1140_v42 = vsub.f32 %v2087_v41, %v1110_v40  ;;  %1615 = vlog2.f32 %v1092_v29 }
 0x56a   :  { %v1606_v44 = vpop.eup %1605  ;;  %v1145_v35 = vsub.f32 %v2092_v43, %v1120_v32 }
 0x56b   :  { %v1608_v37 = vpop.eup %1607  ;;  %1156 = vst [vmem:[#allocation13 + $0x8] sm:$0xff] %v1140_v42  ;;  %v1122_v50 = vmul.f32 0.6931472, %v1606_v44  ;;  %v1094_v54 = vpop.xlane.xlu1 %1093 }
 0x56c   :  { %1161 = vst [vmem:[#allocation13 + $0x30] sm:$0xff] %v1145_v35  ;;  %v1116_v34 = vmul.f32 0.6931472, %v1608_v37  ;;  %1617 = vlog2.f32 %v1094_v54  ;;  %v1100_v58 = vpop.xlane.xlu0 %1099 }
 0x56d   :  { %v1146_v59 = vsub.f32 %v2095_v45, %v1122_v50  ;;  %1619 = vlog2.f32 %v1100_v58 }
 0x56e   :  { %v1610_v46 = vpop.eup %1609  ;;  %v1143_v57 = vsub.f32 %v2100_v55, %v1116_v34 }
 0x56f   :  { %v1612_v56 = vpop.eup %1611  ;;  %1162 = vst [vmem:[#allocation13 + $0x38] sm:$0xff] %v1146_v59  ;;  %v1118_v41 = vmul.f32 0.6931472, %v1610_v46  ;;  %v1102_v62 = vpop.xlane.xlu1 %1101 }
 0x570   :  { %1159 = vst [vmem:[#allocation13 + $0x20] sm:$0xff] %v1143_v57  ;;  %v1128_v43 = vmul.f32 0.6931472, %v1612_v56  ;;  %1621 = vlog2.f32 %v1102_v62  ;;  %v1104_v0 = vpop.xlane.xlu0 %1103 }
 0x571   :  { %v1144_v61 = vsub.f32 %v2103_v60, %v1118_v41  ;;  %1623 = vlog2.f32 %v1104_v0 }
 0x572   :  { %v1614_v1 = vpop.eup %1613  ;;  %v1149_v3 = vsub.f32 %v2108_v63, %v1128_v43 }
 0x573   :  { %v1616_v4 = vpop.eup %1615  ;;  %1160 = vst [vmem:[#allocation13 + $0x28] sm:$0xff] %v1144_v61  ;;  %v1130_v45 = vmul.f32 0.6931472, %v1614_v1  ;;  %v1106_v6 = vpop.xlane.xlu1 %1105 }
 0x574   :  { %1165 = vst [vmem:[#allocation13 + $0x50] sm:$0xff] %v1149_v3  ;;  %v1124_v55 = vmul.f32 0.6931472, %v1616_v4  ;;  %1625 = vlog2.f32 %v1106_v6 }
 0x575   :  { %v1150_v7 = vsub.f32 %v2111_v2, %v1130_v45 }
 0x576   :  { %v1618_v9 = vpop.eup %1617  ;;  %v1147_v10 = vsub.f32 %v2116_v5, %v1124_v55 }
 0x577   :  { %v1620_v11 = vpop.eup %1619  ;;  %1166 = vst [vmem:[#allocation13 + $0x58] sm:$0xff] %v1150_v7  ;;  %v1126_v12 = vmul.f32 0.6931472, %v1618_v9 }
 0x578   :  { %1163 = vst [vmem:[#allocation13 + $0x40] sm:$0xff] %v1147_v10  ;;  %v1132_v60 = vmul.f32 0.6931472, %v1620_v11 }
 0x579   :  { %v1148_v14 = vsub.f32 %v2119_v8, %v1126_v12 }
 0x57a   :  { %v1622_v63 = vpop.eup %1621  ;;  %v1151_v15 = vsub.f32 %v2124_v13, %v1132_v60 }
 0x57b   :  { %v1624_v16 = vpop.eup %1623  ;;  %1164 = vst [vmem:[#allocation13 + $0x48] sm:$0xff] %v1148_v14  ;;  %v1134_v17 = vmul.f32 0.6931472, %v1622_v63 }
 0x57c   :  { %1167 = vst [vmem:[#allocation13 + $0x60] sm:$0xff] %v1151_v15  ;;  %v1136_v19 = vmul.f32 0.6931472, %v1624_v16 }
 0x57d   :  { %v1152_v2 = vsub.f32 %v2128_v18, %v1134_v17 }
 0x57e   :  { %v1626_v20 = vpop.eup %1625  ;;  %v1153_v5 = vsub.f32 %v2132_v21, %v1136_v19 }
 0x57f   :  { %1168 = vst [vmem:[#allocation13 + $0x68] sm:$0xff] %v1152_v2  ;;  %v1138_v47 = vmul.f32 0.6931472, %v1626_v20 }
 0x580   :  { %1169 = vst [vmem:[#allocation13 + $0x70] sm:$0xff] %v1153_v5 }
 0x581   :  { %v1154_v8 = vsub.f32 %v2136_v53, %v1138_v47 }
 0x583   :  { %1170 = vst [vmem:[#allocation13 + $0x78] sm:$0xff] %v1154_v8 }
 0x584   :  { %1770 = shalt.err (!%p1767_p10)
}
 0x585   :  { %s1771_s20 = scalar_lea.hbm %s2196_s8, 2048 }
 0x586   :  { %p1772_p11 = scmp.ne.s32.totalorder %s2196_s8, %s1771_s20  ;;  %p1775_p12 = scmp.lt.u32.totalorder %s1771_s20, %s2196_s8 }
 0x588   :  { %p1777_p13 = pnand %p1775_p12, %p1772_p11 }
 0x58a   :  { %1780 = shalt.err (!%p1777_p13)
}
 0x58b   :  { %1198 = dma.vmem_to_hbm [thread:$0]  %s1193_s16, 2048, %s2196_s8, [#allocation7], %s1801_s15, %s1801_s15, %s1802_s6  }
 0x58c   :  { %1789 = dma.done.wait [#allocation7], 2048  }
 0x58d   :  { %1790 = vsyncadd [#allocation7], 4294965248 }
 0x58e   :  { %1791 = dma.done.wait [#allocation15], 2048  }
 0x58f   :  { %1792 = vsyncadd [#allocation15], 4294965248 }
 0x590   :  { %1217 = vsyncpa [#allocation6], 1 }
 0x591   :  { %1218 = vsyncpa [#allocation9], 1 }
 0x592   :  { %1219 = vsyncpa [#allocation12], 1 }
 0x593   :  { %1220 = vsyncpa [#allocation7], 1 }
 0x594   :  { %1221 = vsyncpa [#allocation15], 1 }
 0x595   :  { %1222 = vsyncmov [#allocation4] }
 0x598   :  { %s1223_s3 = vpop.sfrf %1222 }
 0x599   :  { %p1263_p0 = scmp.ne.s32.totalorder %s1223_s3, 0 }
 0x59b   :  { %1227 = shalt.err (%p1263_p0)  }

</bundles_post_ra>
